<compile_context>
chip_gen: v7x
topology: tpu7x:2x2x1
jax: 0.10.0
libtpu: 0.0.40
codegen_flags: <defaults>
</compile_context>

<pallas_src>
import functools
import math

import jax
import jax.numpy as jnp
from jax.experimental import pallas as pl
from jax.experimental.pallas import tpu as pltpu

PAD_IDX = 1  # facebook/nllb-200 pad_token_id

# ---- Tile defaults --------------------------------------------------------
# MXU-shaped matmul tiles. v6e / v7x: 256-wide M/N tiles feed the 2x256^2 MXU;
# on v5e (4x128^2 MXU, single vst slot) prefer TILE_M = TILE_N = 128, TILE_K = 256-512.
# VMEM footprint at defaults stays ~3 MiB double-buffered, far below the
# per-kernel budget that keeps v7x's 64 MiB VMEM happy.
TILE_M = 256
TILE_N = 256
TILE_K = 512
TILE_FFN_H = 512          # hidden-dim tile of the fused FFN
TILE_Q = 128              # flash-attention q rows per grid step
TILE_KV = 128             # flash-attention kv rows per grid step
VMEM_LIMIT_BYTES = 48 * 1024 * 1024   # explicit scoped-VMEM cap (headroom on v7x)


def _round_up(x, m):
    return (x + m - 1) // m * m


# ----------------------------- Pallas kernels ------------------------------

def _matmul_kernel(x_ref, w_ref, b_ref, o_ref, acc_ref, *, relu):
    """Tiled matmul with f32 accumulator; bias (+ optional ReLU) applied at last k."""
    k = pl.program_id(2)

    @pl.when(k == 0)
    def _():
        acc_ref[...] = jnp.zeros_like(acc_ref)

    acc_ref[...] += jnp.dot(
        x_ref[...].astype(jnp.bfloat16),
        w_ref[...].astype(jnp.bfloat16),
        preferred_element_type=jnp.float32,
    )

    @pl.when(k == pl.num_programs(2) - 1)
    def _():
        y = acc_ref[...] + b_ref[...]
        if relu:
            y = jnp.maximum(y, 0.0)
        o_ref[...] = y.astype(o_ref.dtype)


def linear(x, w, b, relu=False, out_dtype=None, tm=TILE_M, tn=TILE_N, tk=TILE_K):
    """x: (M, K), w: (K, N) (in, out layout), b: (N,) -> (M, N)."""
    M, K = x.shape
    N = w.shape[1]
    out_dtype = x.dtype if out_dtype is None else out_dtype
    tm = min(tm, _round_up(M, 8))
    tn = min(tn, _round_up(N, 128))
    tk = min(tk, _round_up(K, 128))
    Mp, Kp, Np = _round_up(M, tm), _round_up(K, tk), _round_up(N, tn)

    xp = x if (Mp == M and Kp == K) else jnp.pad(x, ((0, Mp - M), (0, Kp - K)))
    wp = w if (Kp == K and Np == N) else jnp.pad(w, ((0, Kp - K), (0, Np - N)))
    bp = b if Np == N else jnp.pad(b, (0, Np - N))

    out = pl.pallas_call(
        functools.partial(_matmul_kernel, relu=relu),
        out_shape=jax.ShapeDtypeStruct((Mp, Np), out_dtype),
        grid_spec=pltpu.PrefetchScalarGridSpec(
            num_scalar_prefetch=0,
            grid=(Mp // tm, Np // tn, Kp // tk),
            in_specs=[
                pl.BlockSpec((tm, tk), lambda i, j, k: (i, k)),
                pl.BlockSpec((tk, tn), lambda i, j, k: (k, j)),
                pl.BlockSpec((1, tn), lambda i, j, k: (0, j)),
            ],
            out_specs=pl.BlockSpec((tm, tn), lambda i, j, k: (i, j)),
            scratch_shapes=[pltpu.VMEM((tm, tn), jnp.float32)],
        ),
        compiler_params=pltpu.CompilerParams(
            dimension_semantics=("parallel", "parallel", "arbitrary"),
            vmem_limit_bytes=VMEM_LIMIT_BYTES,
        ),
    )(xp, wp, bp.reshape(1, Np))
    if Mp == M and Np == N:
        return out
    return out[:M, :N]


def _layernorm_kernel(*refs, eps, has_residual):
    """LayerNorm over the last dim; optionally fuses the residual add."""
    if has_residual:
        x_ref, r_ref, g_ref, b_ref, o_ref = refs
        x = x_ref[...].astype(jnp.float32) + r_ref[...].astype(jnp.float32)
    else:
        x_ref, g_ref, b_ref, o_ref = refs
        x = x_ref[...].astype(jnp.float32)
    mean = jnp.mean(x, axis=-1, keepdims=True)
    var = jnp.mean(jnp.square(x - mean), axis=-1, keepdims=True)
    y = (x - mean) * jax.lax.rsqrt(var + eps)
    o_ref[...] = (y * g_ref[...] + b_ref[...]).astype(o_ref.dtype)


def _layernorm_call(x, residual, gamma, beta, eps=1e-5, tm=TILE_M):
    M, D = x.shape
    tm = min(tm, _round_up(M, 8))
    Mp = _round_up(M, tm)

    def pad_rows(a):
        return a if Mp == M else jnp.pad(a, ((0, Mp - M), (0, 0)))

    args = [pad_rows(x)]
    in_specs = [pl.BlockSpec((tm, D), lambda i: (i, 0))]
    if residual is not None:
        args.append(pad_rows(residual))
        in_specs.append(pl.BlockSpec((tm, D), lambda i: (i, 0)))
    args += [gamma.reshape(1, D), beta.reshape(1, D)]
    in_specs += [pl.BlockSpec((1, D), lambda i: (0, 0)),
                 pl.BlockSpec((1, D), lambda i: (0, 0))]

    out = pl.pallas_call(
        functools.partial(_layernorm_kernel, eps=eps,
                          has_residual=residual is not None),
        out_shape=jax.ShapeDtypeStruct((Mp, D), x.dtype),
        grid_spec=pltpu.PrefetchScalarGridSpec(
            num_scalar_prefetch=0,
            grid=(Mp // tm,),
            in_specs=in_specs,
            out_specs=pl.BlockSpec((tm, D), lambda i: (i, 0)),
        ),
        compiler_params=pltpu.CompilerParams(
            dimension_semantics=("parallel",),
            vmem_limit_bytes=VMEM_LIMIT_BYTES,
        ),
    )(*args)
    return out if Mp == M else out[:M]


def layernorm(x, gamma, beta, eps=1e-5):
    return _layernorm_call(x, None, gamma, beta, eps)


def add_layernorm(x, residual, gamma, beta, eps=1e-5):
    """LayerNorm(x + residual) with the add fused into the kernel."""
    return _layernorm_call(x, residual, gamma, beta, eps)


def _ffn_kernel(x_ref, w1_ref, b1_ref, w2_ref, b2_ref, o_ref, acc_ref):
    """Fused FFN: relu(x @ w1 + b1) @ w2 + b2, tiled over the hidden dim."""
    h_idx = pl.program_id(1)

    @pl.when(h_idx == 0)
    def _():
        acc_ref[...] = jnp.zeros_like(acc_ref)

    x = x_ref[...].astype(jnp.bfloat16)
    h = jnp.dot(x, w1_ref[...].astype(jnp.bfloat16),
                preferred_element_type=jnp.float32)
    h = jnp.maximum(h + b1_ref[...], 0.0)
    acc_ref[...] += jnp.dot(h.astype(jnp.bfloat16), w2_ref[...].astype(jnp.bfloat16),
                            preferred_element_type=jnp.float32)

    @pl.when(h_idx == pl.num_programs(1) - 1)
    def _():
        o_ref[...] = (acc_ref[...] + b2_ref[...]).astype(o_ref.dtype)


def fused_ffn(x, w1, b1, w2, b2, tm=TILE_M, th=TILE_FFN_H):
    """x: (M, D) -> (M, D); the (M, H) hidden activation never leaves VMEM."""
    M, D = x.shape
    H = w1.shape[1]
    tm = min(tm, _round_up(M, 8))
    th = min(th, _round_up(H, 128))
    Mp, Hp = _round_up(M, tm), _round_up(H, th)

    xp = x if Mp == M else jnp.pad(x, ((0, Mp - M), (0, 0)))
    w1p = w1 if Hp == H else jnp.pad(w1, ((0, 0), (0, Hp - H)))
    b1p = b1 if Hp == H else jnp.pad(b1, (0, Hp - H))
    w2p = w2 if Hp == H else jnp.pad(w2, ((0, Hp - H), (0, 0)))

    out = pl.pallas_call(
        _ffn_kernel,
        out_shape=jax.ShapeDtypeStruct((Mp, D), x.dtype),
        grid_spec=pltpu.PrefetchScalarGridSpec(
            num_scalar_prefetch=0,
            grid=(Mp // tm, Hp // th),
            in_specs=[
                pl.BlockSpec((tm, D), lambda i, h: (i, 0)),
                pl.BlockSpec((D, th), lambda i, h: (0, h)),
                pl.BlockSpec((1, th), lambda i, h: (0, h)),
                pl.BlockSpec((th, D), lambda i, h: (h, 0)),
                pl.BlockSpec((1, D), lambda i, h: (0, 0)),
            ],
            out_specs=pl.BlockSpec((tm, D), lambda i, h: (i, 0)),
            scratch_shapes=[pltpu.VMEM((tm, D), jnp.float32)],
        ),
        compiler_params=pltpu.CompilerParams(
            dimension_semantics=("parallel", "arbitrary"),
            vmem_limit_bytes=VMEM_LIMIT_BYTES,
        ),
    )(xp, w1p, b1p.reshape(1, Hp), w2p, b2.reshape(1, D))
    return out if Mp == M else out[:M]


def _flash_attn_kernel(q_ref, k_ref, v_ref, o_ref, m_sc, l_sc, acc_sc,
                       *, kv_len, tkv, mask_kv):
    """Online-softmax attention; 1/sqrt(Dh) is already folded into q."""
    kv = pl.program_id(2)

    @pl.when(kv == 0)
    def _():
        m_sc[...] = jnp.full(m_sc.shape, -jnp.inf, jnp.float32)
        l_sc[...] = jnp.zeros(l_sc.shape, jnp.float32)
        acc_sc[...] = jnp.zeros(acc_sc.shape, jnp.float32)

    q = q_ref[...].astype(jnp.bfloat16)                     # (1, tq, Dhp)
    k = k_ref[...].astype(jnp.bfloat16)                     # (1, tkv, Dhp)
    s = jnp.einsum("bqd,bkd->bqk", q, k,
                   preferred_element_type=jnp.float32)      # (1, tq, tkv)
    if mask_kv:  # mask out zero-padded key rows (only emitted when padding exists)
        col = kv * tkv + jax.lax.broadcasted_iota(jnp.int32, s.shape, 2)
        s = jnp.where(col < kv_len, s, -jnp.inf)

    m_prev = m_sc[...]
    m_new = jnp.maximum(m_prev, jnp.max(s, axis=-1, keepdims=True))
    alpha = jnp.exp(m_prev - m_new)
    p = jnp.exp(s - m_new)
    l_sc[...] = alpha * l_sc[...] + jnp.sum(p, axis=-1, keepdims=True)
    acc_sc[...] = alpha * acc_sc[...] + jnp.einsum(
        "bqk,bkd->bqd", p.astype(jnp.bfloat16), v_ref[...].astype(jnp.bfloat16),
        preferred_element_type=jnp.float32)
    m_sc[...] = m_new

    @pl.when(kv == pl.num_programs(2) - 1)
    def _():
        inv_l = pl.reciprocal(l_sc[...], approx=True)
        o_ref[...] = (acc_sc[...] * inv_l).astype(o_ref.dtype)


def flash_attention(q, k, v, tq=TILE_Q, tkv=TILE_KV):
    """q: (BH, Sq, Dh), k/v: (BH, Sk, Dh) -> (BH, Sq, Dh).

    Head dim is zero-padded to 128 so the output/score last dims are lane-dense
    (unmasked vst); KV is tiled as an 'arbitrary' grid axis (flash-style, O(tile) VMEM).
    """
    BH, Sq, Dh = q.shape
    Sk = k.shape[1]
    Dhp = _round_up(Dh, 128)
    tq = min(tq, _round_up(Sq, 8))
    tkv = min(tkv, _round_up(Sk, 8))
    Sqp, Skp = _round_up(Sq, tq), _round_up(Sk, tkv)

    def pad3(a, sp):
        S = a.shape[1]
        if sp == S and Dhp == Dh:
            return a
        return jnp.pad(a, ((0, 0), (0, sp - S), (0, Dhp - Dh)))

    qp, kp, vp = pad3(q, Sqp), pad3(k, Skp), pad3(v, Skp)
    mask_kv = Skp != Sk

    out = pl.pallas_call(
        functools.partial(_flash_attn_kernel, kv_len=Sk, tkv=tkv, mask_kv=mask_kv),
        out_shape=jax.ShapeDtypeStruct((BH, Sqp, Dhp), q.dtype),
        grid_spec=pltpu.PrefetchScalarGridSpec(
            num_scalar_prefetch=0,
            grid=(BH, Sqp // tq, Skp // tkv),
            in_specs=[
                pl.BlockSpec((1, tq, Dhp), lambda b, qi, ki: (b, qi, 0)),
                pl.BlockSpec((1, tkv, Dhp), lambda b, qi, ki: (b, ki, 0)),
                pl.BlockSpec((1, tkv, Dhp), lambda b, qi, ki: (b, ki, 0)),
            ],
            out_specs=pl.BlockSpec((1, tq, Dhp), lambda b, qi, ki: (b, qi, 0)),
            scratch_shapes=[
                pltpu.VMEM((1, tq, 1), jnp.float32),     # running max
                pltpu.VMEM((1, tq, 1), jnp.float32),     # running denom
                pltpu.VMEM((1, tq, Dhp), jnp.float32),   # running numerator
            ],
        ),
        compiler_params=pltpu.CompilerParams(
            dimension_semantics=("parallel", "parallel", "arbitrary"),
            vmem_limit_bytes=VMEM_LIMIT_BYTES,
        ),
    )(qp, kp, vp)
    return out[:, :Sq, :Dh]


# ----------------------------- Model pieces --------------------------------

def multi_head_attention(x_q, x_kv, p, num_heads, is_self_attn):
    """x_q: (B, Sq, D), x_kv: (B, Skv, D) -> (B*Sq, D) in float32."""
    B, Sq, D = x_q.shape
    Skv = x_kv.shape[1]
    Dh = D // num_heads

    # Q/K/V projections emit bf16: attention math is bf16 anyway, and this halves
    # the attention DMA and the head split/merge relayout bytes.
    if is_self_attn:
        qkv = linear(x_q.reshape(B * Sq, D), p["w_qkv"], p["b_qkv"],
                     out_dtype=jnp.bfloat16)                            # fused QKV
        q, k, v = jnp.split(qkv, 3, axis=-1)
    else:
        q = linear(x_q.reshape(B * Sq, D), p["w_q"], p["b_q"],
                   out_dtype=jnp.bfloat16)
        kv = linear(x_kv.reshape(B * Skv, D), p["w_kv"], p["b_kv"],
                    out_dtype=jnp.bfloat16)                             # fused KV
        k, v = jnp.split(kv, 2, axis=-1)

    # TODO(synk): head split/merge transposes remain XLA glue; a fully-fused
    # in-kernel head split would remove these two relayout passes.
    q = q.reshape(B, Sq, num_heads, Dh).transpose(0, 2, 1, 3).reshape(B * num_heads, Sq, Dh)
    k = k.reshape(B, Skv, num_heads, Dh).transpose(0, 2, 1, 3).reshape(B * num_heads, Skv, Dh)
    v = v.reshape(B, Skv, num_heads, Dh).transpose(0, 2, 1, 3).reshape(B * num_heads, Skv, Dh)

    o = flash_attention(q, k, v)                                        # scale folded into w_q
    o = o.reshape(B, num_heads, Sq, Dh).transpose(0, 2, 1, 3).reshape(B * Sq, D)
    # Output projection back to f32 so the residual + LayerNorm stay full precision.
    return linear(o, p["wo"], p["bo"], out_dtype=jnp.float32)


def encoder_layer(x, p, num_heads):
    B, S, D = x.shape
    a = multi_head_attention(x, x, p["self_attn"], num_heads, True)
    x2 = add_layernorm(x.reshape(B * S, D), a, p["norm1_g"], p["norm1_b"])
    h = fused_ffn(x2, p["ffn_w1"], p["ffn_b1"], p["ffn_w2"], p["ffn_b2"])
    x2 = add_layernorm(x2, h, p["norm2_g"], p["norm2_b"])
    return x2.reshape(B, S, D)


def decoder_layer(x, memory, p, num_heads):
    B, S, D = x.shape
    a = multi_head_attention(x, x, p["self_attn"], num_heads, True)
    x2 = add_layernorm(x.reshape(B * S, D), a, p["norm1_g"], p["norm1_b"])
    c = multi_head_attention(x2.reshape(B, S, D), memory, p["cross_attn"], num_heads, False)
    x2 = add_layernorm(x2, c, p["norm2_g"], p["norm2_b"])
    h = fused_ffn(x2, p["ffn_w1"], p["ffn_b1"], p["ffn_w2"], p["ffn_b2"])
    x2 = add_layernorm(x2, h, p["norm3_g"], p["norm3_b"])
    return x2.reshape(B, S, D)


def transformer_forward(params, src_ids, tgt_ids, num_heads):
    # TODO(synk): embedding gather (token-id lookup) stays in plain JAX glue.
    src = params["src_embed"][src_ids]          # (B, Ss, D)
    tgt = params["tgt_embed"][tgt_ids]          # (B, St, D)

    # Encoder stack + final encoder LayerNorm (nn.Transformer adds one).
    x = src
    for lp in params["enc_layers"]:
        x = encoder_layer(x, lp, num_heads)
    B, Ss, D = x.shape
    memory = layernorm(x.reshape(B * Ss, D),
                       params["enc_norm_g"], params["enc_norm_b"]).reshape(B, Ss, D)

    # Decoder stack + final decoder LayerNorm.
    # TODO(synk): matches the reference exactly (no causal / padding masks are passed).
    y = tgt
    for lp in params["dec_layers"]:
        y = decoder_layer(y, memory, lp, num_heads)
    Bt, St, _ = y.shape
    y2 = layernorm(y.reshape(Bt * St, D),
                   params["dec_norm_g"], params["dec_norm_b"])

    # Final vocabulary projection (tiled, N-parallel, K 'arbitrary' with accumulator).
    logits = linear(y2, params["fc_out_w"], params["fc_out_b"], out_dtype=jnp.float32)
    return logits.reshape(Bt, St, -1)


# ----------------------------- Parameters ----------------------------------

def init_params(key, src_vocab, tgt_vocab, d_model, num_layers, ffn_hidden):
    """PyTorch-equivalent (unfused) parameter layout, all float32."""
    keys = iter(jax.random.split(key, 4096))
    nk = lambda: next(keys)

    def dense(shape):
        return (jax.random.normal(nk(), shape, jnp.float32) * 0.02).astype(jnp.float32)

    def mha_params():
        return dict(
            wq=dense((d_model, d_model)), bq=jnp.zeros((d_model,), jnp.float32),
            wk=dense((d_model, d_model)), bk=jnp.zeros((d_model,), jnp.float32),
            wv=dense((d_model, d_model)), bv=jnp.zeros((d_model,), jnp.float32),
            wo=dense((d_model, d_model)), bo=jnp.zeros((d_model,), jnp.float32),
        )

    def enc_layer_params():
        return dict(
            self_attn=mha_params(),
            norm1_g=jnp.ones((d_model,), jnp.float32), norm1_b=jnp.zeros((d_model,), jnp.float32),
            ffn_w1=dense((d_model, ffn_hidden)), ffn_b1=jnp.zeros((ffn_hidden,), jnp.float32),
            ffn_w2=dense((ffn_hidden, d_model)), ffn_b2=jnp.zeros((d_model,), jnp.float32),
            norm2_g=jnp.ones((d_model,), jnp.float32), norm2_b=jnp.zeros((d_model,), jnp.float32),
        )

    def dec_layer_params():
        p = enc_layer_params()
        p["cross_attn"] = mha_params()
        p["norm3_g"] = jnp.ones((d_model,), jnp.float32)
        p["norm3_b"] = jnp.zeros((d_model,), jnp.float32)
        return p

    src_embed = dense((src_vocab, d_model)).at[PAD_IDX].set(0.0)  # padding_idx row is zero
    tgt_embed = dense((tgt_vocab, d_model)).at[PAD_IDX].set(0.0)

    return dict(
        src_embed=src_embed,
        tgt_embed=tgt_embed,
        enc_layers=[enc_layer_params() for _ in range(num_layers)],
        dec_layers=[dec_layer_params() for _ in range(num_layers)],
        enc_norm_g=jnp.ones((d_model,), jnp.float32), enc_norm_b=jnp.zeros((d_model,), jnp.float32),
        dec_norm_g=jnp.ones((d_model,), jnp.float32), dec_norm_b=jnp.zeros((d_model,), jnp.float32),
        fc_out_w=dense((d_model, tgt_vocab)), fc_out_b=jnp.zeros((tgt_vocab,), jnp.float32),
    )


def prepare_params(params, num_heads):
    """One-time prep: fuse Q|K|V (self-attn) / K|V (cross-attn) projection weights,
    fold the 1/sqrt(Dh) attention scale into the Q projection, and cast all matmul
    weights to bf16 (kernels compute in bf16 anyway; halves weight DMA traffic).
    Biases / LayerNorm params / embeddings stay float32."""
    d_model = params["src_embed"].shape[1]
    scale = 1.0 / math.sqrt(d_model // num_heads)
    bf = lambda w: w.astype(jnp.bfloat16)

    def fuse_mha(p, is_self):
        wq, bq = p["wq"] * scale, p["bq"] * scale
        if is_self:
            return dict(
                w_qkv=bf(jnp.concatenate([wq, p["wk"], p["wv"]], axis=1)),
                b_qkv=jnp.concatenate([bq, p["bk"], p["bv"]]),
                wo=bf(p["wo"]), bo=p["bo"])
        return dict(
            w_q=bf(wq), b_q=bq,
            w_kv=bf(jnp.concatenate([p["wk"], p["wv"]], axis=1)),
            b_kv=jnp.concatenate([p["bk"], p["bv"]]),
            wo=bf(p["wo"]), bo=p["bo"])

    def fuse_layer(lp, has_cross):
        out = dict(lp)
        out["self_attn"] = fuse_mha(lp["self_attn"], True)
        if has_cross:
            out["cross_attn"] = fuse_mha(lp["cross_attn"], False)
        out["ffn_w1"] = bf(lp["ffn_w1"])
        out["ffn_w2"] = bf(lp["ffn_w2"])
        return out

    fused = dict(params)
    fused["enc_layers"] = [fuse_layer(lp, False) for lp in params["enc_layers"]]
    fused["dec_layers"] = [fuse_layer(lp, True) for lp in params["dec_layers"]]
    fused["fc_out_w"] = bf(params["fc_out_w"])
    return fused


# ----------------------------- Main -----------------------------------------

if __name__ == "__main__":
    # Small, forward-consistent, TPU-friendly shapes (module defaults scaled down).
    SRC_VOCAB, TGT_VOCAB = 256, 256
    EMBED, HEADS, LAYERS, FFN = 128, 4, 2, 256
    B, S_SRC, S_TGT = 2, 16, 16

    root = jax.random.PRNGKey(0)
    k_param, k_src, k_tgt = jax.random.split(root, 3)

    params = prepare_params(
        init_params(k_param, SRC_VOCAB, TGT_VOCAB, EMBED, LAYERS, FFN), HEADS)
    src_ids = jax.random.randint(k_src, (B, S_SRC), 0, SRC_VOCAB, dtype=jnp.int32)
    tgt_ids = jax.random.randint(k_tgt, (B, S_TGT), 0, TGT_VOCAB, dtype=jnp.int32)

    # TODO(synk): dropout inside nn.Transformer is a no-op in eval mode; not modeled.
    fwd = jax.jit(lambda p, s, t: transformer_forward(p, s, t, HEADS))
    logits = jax.block_until_ready(fwd(params, src_ids, tgt_ids))

    assert logits.shape == (B, S_TGT, TGT_VOCAB), logits.shape
    assert bool(jnp.all(jnp.isfinite(logits)))
    print("KERNEL_OK")
</pallas_src>

<mosaic_0001>
module attributes {stable_mosaic.version = 11 : i64} {
  func.func @_matmul_kernel(%arg0: i32, %arg1: i32, %arg2: i32, %arg3: memref<32x128xf32, #tpu.memory_space<vmem>>, %arg4: memref<128x256xbf16, #tpu.memory_space<vmem>>, %arg5: memref<1x256xf32, #tpu.memory_space<vmem>>, %arg6: memref<32x256xbf16, #tpu.memory_space<vmem>>, %arg7: memref<32x256xf32, #tpu.memory_space<vmem>>) attributes {dimension_semantics = [#tpu.dimension_semantics<parallel>, #tpu.dimension_semantics<parallel>, #tpu.dimension_semantics<arbitrary>], iteration_bounds = array<i64: 1, 2, 1>, scalar_prefetch = 0 : i64, scratch_operands = 1 : i64, tpu.core_type = #tpu.core_type<tc>, window_params = [{transform_indices = @transform_0, window_bounds = array<i64: 32, 128>}, {transform_indices = @transform_1, window_bounds = array<i64: 128, 256>}, {transform_indices = @transform_2, window_bounds = array<i64: 1, 256>}, {transform_indices = @transform_3, window_bounds = array<i64: 32, 256>}]} {
    %c0_i32 = arith.constant 0 : i32
    %0 = arith.cmpi eq, %arg2, %c0_i32 : i32
    %1 = arith.extui %0 : i1 to i32
    %c0_i32_0 = arith.constant 0 : i32
    %2 = arith.cmpi ne, %1, %c0_i32_0 : i32
    scf.if %2 {
      %cst_10 = arith.constant 0.000000e+00 : f32
      %13 = vector.broadcast %cst_10 : f32 to vector<32x256xf32>
      %c0_11 = arith.constant 0 : index
      %c0_12 = arith.constant 0 : index
      %14 = vector.load %arg7[%c0_11, %c0_12] : memref<32x256xf32, #tpu.memory_space<vmem>>, vector<32x256xf32>
      tpu.vector_store %arg7[%c0_11, %c0_12], %13 {strides = array<i32>} : memref<32x256xf32, #tpu.memory_space<vmem>>, vector<32x256xf32>,
    } else {
    }
    %c0 = arith.constant 0 : index
    %c0_1 = arith.constant 0 : index
    %3 = vector.load %arg7[%c0, %c0_1] : memref<32x256xf32, #tpu.memory_space<vmem>>, vector<32x256xf32>
    %c0_2 = arith.constant 0 : index
    %c0_3 = arith.constant 0 : index
    %4 = vector.load %arg3[%c0_2, %c0_3] : memref<32x128xf32, #tpu.memory_space<vmem>>, vector<32x128xf32>
    %5 = arith.truncf %4 : vector<32x128xf32> to vector<32x128xbf16>
    %c0_4 = arith.constant 0 : index
    %c0_5 = arith.constant 0 : index
    %6 = vector.load %arg4[%c0_4, %c0_5] : memref<128x256xbf16, #tpu.memory_space<vmem>>, vector<128x256xbf16>
    %cst = arith.constant dense<0.000000e+00> : vector<32x256xf32>
    %7 = tpu.matmul %5, %6, %cst {dimension_numbers = #tpu.dot_dimension_numbers<[1], [0], [0], [1], [0, 0, 1, 1], [], []>} : vector<32x128xbf16>, vector<128x256xbf16>, vector<32x256xf32> -> vector<32x256xf32>
    %8 = arith.addf %3, %7 : vector<32x256xf32>
    %c0_6 = arith.constant 0 : index
    %c0_7 = arith.constant 0 : index
    %9 = vector.load %arg7[%c0_6, %c0_7] : memref<32x256xf32, #tpu.memory_space<vmem>>, vector<32x256xf32>
    tpu.vector_store %arg7[%c0_6, %c0_7], %8 {strides = array<i32>} : memref<32x256xf32, #tpu.memory_space<vmem>>, vector<32x256xf32>,
    %c0_i32_8 = arith.constant 0 : i32
    %10 = arith.cmpi eq, %arg2, %c0_i32_8 : i32
    %11 = arith.extui %10 : i1 to i32
    %c0_i32_9 = arith.constant 0 : i32
    %12 = arith.cmpi ne, %11, %c0_i32_9 : i32
    scf.if %12 {
      %c0_10 = arith.constant 0 : index
      %c0_11 = arith.constant 0 : index
      %13 = vector.load %arg7[%c0_10, %c0_11] : memref<32x256xf32, #tpu.memory_space<vmem>>, vector<32x256xf32>
      %c0_12 = arith.constant 0 : index
      %c0_13 = arith.constant 0 : index
      %14 = vector.load %arg5[%c0_12, %c0_13] : memref<1x256xf32, #tpu.memory_space<vmem>>, vector<1x256xf32>
      %15 = vector.broadcast %14 : vector<1x256xf32> to vector<32x256xf32>
      %16 = arith.addf %13, %15 : vector<32x256xf32>
      %17 = arith.truncf %16 : vector<32x256xf32> to vector<32x256xbf16>
      %c0_14 = arith.constant 0 : index
      %c0_15 = arith.constant 0 : index
      %18 = vector.load %arg6[%c0_14, %c0_15] : memref<32x256xbf16, #tpu.memory_space<vmem>>, vector<32x256xbf16>
      tpu.vector_store %arg6[%c0_14, %c0_15], %17 {strides = array<i32>} : memref<32x256xbf16, #tpu.memory_space<vmem>>, vector<32x256xbf16>,
    } else {
    }
    return
  }
  func.func @transform_0(%arg0: i32, %arg1: i32, %arg2: i32) -> (i32, i32) {
    %c0_i32 = arith.constant 0 : i32
    return %arg0, %arg2 : i32, i32
  }
  func.func @transform_1(%arg0: i32, %arg1: i32, %arg2: i32) -> (i32, i32) {
    %c0_i32 = arith.constant 0 : i32
    return %arg2, %arg1 : i32, i32
  }
  func.func @transform_2(%arg0: i32, %arg1: i32, %arg2: i32) -> (i32, i32) {
    %c0_i32 = arith.constant 0 : i32
    %c0_i32_0 = arith.constant 0 : i32
    return %c0_i32, %arg1 : i32, i32
  }
  func.func @transform_3(%arg0: i32, %arg1: i32, %arg2: i32) -> (i32, i32) {
    %c0_i32 = arith.constant 0 : i32
    return %arg0, %arg1 : i32, i32
  }
}

module attributes {stable_mosaic.version = 11 : i64} {
  func.func @_flash_attn_kernel(%arg0: i32, %arg1: i32, %arg2: i32, %arg3: memref<1x16x128xbf16, #tpu.memory_space<vmem>>, %arg4: memref<1x16x128xbf16, #tpu.memory_space<vmem>>, %arg5: memref<1x16x128xbf16, #tpu.memory_space<vmem>>, %arg6: memref<1x16x128xbf16, #tpu.memory_space<vmem>>, %arg7: memref<1x16x1xf32, #tpu.memory_space<vmem>>, %arg8: memref<1x16x1xf32, #tpu.memory_space<vmem>>, %arg9: memref<1x16x128xf32, #tpu.memory_space<vmem>>) attributes {dimension_semantics = [#tpu.dimension_semantics<parallel>, #tpu.dimension_semantics<parallel>, #tpu.dimension_semantics<arbitrary>], iteration_bounds = array<i64: 8, 1, 1>, scalar_prefetch = 0 : i64, scratch_operands = 3 : i64, tpu.core_type = #tpu.core_type<tc>, window_params = [{transform_indices = @transform_0, window_bounds = array<i64: 1, 16, 128>}, {transform_indices = @transform_1, window_bounds = array<i64: 1, 16, 128>}, {transform_indices = @transform_2, window_bounds = array<i64: 1, 16, 128>}, {transform_indices = @transform_3, window_bounds = array<i64: 1, 16, 128>}]} {
    %c0_i32 = arith.constant 0 : i32
    %0 = arith.cmpi eq, %arg2, %c0_i32 : i32
    %1 = arith.extui %0 : i1 to i32
    %c0_i32_0 = arith.constant 0 : i32
    %2 = arith.cmpi ne, %1, %c0_i32_0 : i32
    scf.if %2 {
      %cst_32 = arith.constant 0xFF800000 : f32
      %33 = vector.broadcast %cst_32 : f32 to vector<1x16x1xf32>
      %c0_33 = arith.constant 0 : index
      %c0_34 = arith.constant 0 : index
      %c0_35 = arith.constant 0 : index
      %34 = vector.load %arg7[%c0_33, %c0_34, %c0_35] : memref<1x16x1xf32, #tpu.memory_space<vmem>>, vector<1x16x1xf32>
      tpu.vector_store %arg7[%c0_33, %c0_34, %c0_35], %33 {strides = array<i32>} : memref<1x16x1xf32, #tpu.memory_space<vmem>>, vector<1x16x1xf32>,
      %cst_36 = arith.constant 0.000000e+00 : f32
      %35 = vector.broadcast %cst_36 : f32 to vector<1x16x1xf32>
      %c0_37 = arith.constant 0 : index
      %c0_38 = arith.constant 0 : index
      %c0_39 = arith.constant 0 : index
      %36 = vector.load %arg8[%c0_37, %c0_38, %c0_39] : memref<1x16x1xf32, #tpu.memory_space<vmem>>, vector<1x16x1xf32>
      tpu.vector_store %arg8[%c0_37, %c0_38, %c0_39], %35 {strides = array<i32>} : memref<1x16x1xf32, #tpu.memory_space<vmem>>, vector<1x16x1xf32>,
      %cst_40 = arith.constant 0.000000e+00 : f32
      %37 = vector.broadcast %cst_40 : f32 to vector<1x16x128xf32>
      %c0_41 = arith.constant 0 : index
      %c0_42 = arith.constant 0 : index
      %c0_43 = arith.constant 0 : index
      %38 = vector.load %arg9[%c0_41, %c0_42, %c0_43] : memref<1x16x128xf32, #tpu.memory_space<vmem>>, vector<1x16x128xf32>
      tpu.vector_store %arg9[%c0_41, %c0_42, %c0_43], %37 {strides = array<i32>} : memref<1x16x128xf32, #tpu.memory_space<vmem>>, vector<1x16x128xf32>,
    } else {
    }
    %c0 = arith.constant 0 : index
    %c0_1 = arith.constant 0 : index
    %c0_2 = arith.constant 0 : index
    %3 = vector.load %arg3[%c0, %c0_1, %c0_2] : memref<1x16x128xbf16, #tpu.memory_space<vmem>>, vector<1x16x128xbf16>
    %c0_3 = arith.constant 0 : index
    %c0_4 = arith.constant 0 : index
    %c0_5 = arith.constant 0 : index
    %4 = vector.load %arg4[%c0_3, %c0_4, %c0_5] : memref<1x16x128xbf16, #tpu.memory_space<vmem>>, vector<1x16x128xbf16>
    "tpu.trace_start"() <{level = 10 : i32, message = "bqd,bkd->bqk"}> : () -> ()
    %cst = arith.constant dense<0.000000e+00> : vector<1x16x16xf32>
    %5 = tpu.matmul %3, %4, %cst {dimension_numbers = #tpu.dot_dimension_numbers<[2], [2], [1], [1], [0, 0, 0, 1, 1, 1], [0], [0]>} : vector<1x16x128xbf16>, vector<1x16x128xbf16>, vector<1x16x16xf32> -> vector<1x16x16xf32>
    "tpu.trace_stop"() : () -> ()
    %c0_6 = arith.constant 0 : index
    %c0_7 = arith.constant 0 : index
    %c0_8 = arith.constant 0 : index
    %6 = vector.load %arg7[%c0_6, %c0_7, %c0_8] : memref<1x16x1xf32, #tpu.memory_space<vmem>>, vector<1x16x1xf32>
    %cst_9 = arith.constant dense<0xFF800000> : vector<1x16xf32>
    %7 = vector.multi_reduction <maximumf>, %5, %cst_9 [2] : vector<1x16x16xf32> to vector<1x16xf32>
    %8 = vector.shape_cast %7 : vector<1x16xf32> to vector<1x16x1xf32>
    %9 = arith.maximumf %6, %8 : vector<1x16x1xf32>
    %10 = arith.subf %6, %9 : vector<1x16x1xf32>
    %11 = math.exp %10 : vector<1x16x1xf32>
    %12 = vector.broadcast %9 : vector<1x16x1xf32> to vector<1x16x16xf32>
    %13 = arith.subf %5, %12 : vector<1x16x16xf32>
    %14 = math.exp %13 : vector<1x16x16xf32>
    %c0_10 = arith.constant 0 : index
    %c0_11 = arith.constant 0 : index
    %c0_12 = arith.constant 0 : index
    %15 = vector.load %arg8[%c0_10, %c0_11, %c0_12] : memref<1x16x1xf32, #tpu.memory_space<vmem>>, vector<1x16x1xf32>
    %16 = arith.mulf %11, %15 : vector<1x16x1xf32>
    %cst_13 = arith.constant dense<0.000000e+00> : vector<1x16xf32>
    %17 = vector.multi_reduction <add>, %14, %cst_13 [2] : vector<1x16x16xf32> to vector<1x16xf32>
    %18 = vector.shape_cast %17 : vector<1x16xf32> to vector<1x16x1xf32>
    %19 = arith.addf %16, %18 : vector<1x16x1xf32>
    %c0_14 = arith.constant 0 : index
    %c0_15 = arith.constant 0 : index
    %c0_16 = arith.constant 0 : index
    %20 = vector.load %arg8[%c0_14, %c0_15, %c0_16] : memref<1x16x1xf32, #tpu.memory_space<vmem>>, vector<1x16x1xf32>
    tpu.vector_store %arg8[%c0_14, %c0_15, %c0_16], %19 {strides = array<i32>} : memref<1x16x1xf32, #tpu.memory_space<vmem>>, vector<1x16x1xf32>,
    %c0_17 = arith.constant 0 : index
    %c0_18 = arith.constant 0 : index
    %c0_19 = arith.constant 0 : index
    %21 = vector.load %arg9[%c0_17, %c0_18, %c0_19] : memref<1x16x128xf32, #tpu.memory_space<vmem>>, vector<1x16x128xf32>
    %22 = vector.broadcast %11 : vector<1x16x1xf32> to vector<1x16x128xf32>
    %23 = arith.mulf %22, %21 : vector<1x16x128xf32>
    %24 = arith.truncf %14 : vector<1x16x16xf32> to vector<1x16x16xbf16>
    %c0_20 = arith.constant 0 : index
    %c0_21 = arith.constant 0 : index
    %c0_22 = arith.constant 0 : index
    %25 = vector.load %arg5[%c0_20, %c0_21, %c0_22] : memref<1x16x128xbf16, #tpu.memory_space<vmem>>, vector<1x16x128xbf16>
    "tpu.trace_start"() <{level = 10 : i32, message = "bqk,bkd->bqd"}> : () -> ()
    %cst_23 = arith.constant dense<0.000000e+00> : vector<1x16x128xf32>
    %26 = tpu.matmul %24, %25, %cst_23 {dimension_numbers = #tpu.dot_dimension_numbers<[2], [1], [1], [2], [0, 0, 0, 1, 1, 2], [0], [0]>} : vector<1x16x16xbf16>, vector<1x16x128xbf16>, vector<1x16x128xf32> -> vector<1x16x128xf32>
    "tpu.trace_stop"() : () -> ()
    %27 = arith.addf %23, %26 : vector<1x16x128xf32>
    %c0_24 = arith.constant 0 : index
    %c0_25 = arith.constant 0 : index
    %c0_26 = arith.constant 0 : index
    %28 = vector.load %arg9[%c0_24, %c0_25, %c0_26] : memref<1x16x128xf32, #tpu.memory_space<vmem>>, vector<1x16x128xf32>
    tpu.vector_store %arg9[%c0_24, %c0_25, %c0_26], %27 {strides = array<i32>} : memref<1x16x128xf32, #tpu.memory_space<vmem>>, vector<1x16x128xf32>,
    %c0_27 = arith.constant 0 : index
    %c0_28 = arith.constant 0 : index
    %c0_29 = arith.constant 0 : index
    %29 = vector.load %arg7[%c0_27, %c0_28, %c0_29] : memref<1x16x1xf32, #tpu.memory_space<vmem>>, vector<1x16x1xf32>
    tpu.vector_store %arg7[%c0_27, %c0_28, %c0_29], %9 {strides = array<i32>} : memref<1x16x1xf32, #tpu.memory_space<vmem>>, vector<1x16x1xf32>,
    %c0_i32_30 = arith.constant 0 : i32
    %30 = arith.cmpi eq, %arg2, %c0_i32_30 : i32
    %31 = arith.extui %30 : i1 to i32
    %c0_i32_31 = arith.constant 0 : i32
    %32 = arith.cmpi ne, %31, %c0_i32_31 : i32
    scf.if %32 {
      %c0_32 = arith.constant 0 : index
      %c0_33 = arith.constant 0 : index
      %c0_34 = arith.constant 0 : index
      %33 = vector.load %arg8[%c0_32, %c0_33, %c0_34] : memref<1x16x1xf32, #tpu.memory_space<vmem>>, vector<1x16x1xf32>
      %34 = tpu.reciprocal %33 {approx = true} : vector<1x16x1xf32> -> vector<1x16x1xf32>
      %c0_35 = arith.constant 0 : index
      %c0_36 = arith.constant 0 : index
      %c0_37 = arith.constant 0 : index
      %35 = vector.load %arg9[%c0_35, %c0_36, %c0_37] : memref<1x16x128xf32, #tpu.memory_space<vmem>>, vector<1x16x128xf32>
      %36 = vector.broadcast %34 : vector<1x16x1xf32> to vector<1x16x128xf32>
      %37 = arith.mulf %35, %36 : vector<1x16x128xf32>
      %38 = arith.truncf %37 : vector<1x16x128xf32> to vector<1x16x128xbf16>
      %c0_38 = arith.constant 0 : index
      %c0_39 = arith.constant 0 : index
      %c0_40 = arith.constant 0 : index
      %39 = vector.load %arg6[%c0_38, %c0_39, %c0_40] : memref<1x16x128xbf16, #tpu.memory_space<vmem>>, vector<1x16x128xbf16>
      tpu.vector_store %arg6[%c0_38, %c0_39, %c0_40], %38 {strides = array<i32>} : memref<1x16x128xbf16, #tpu.memory_space<vmem>>, vector<1x16x128xbf16>,
    } else {
    }
    return
  }
  func.func @transform_0(%arg0: i32, %arg1: i32, %arg2: i32) -> (i32, i32, i32) {
    %c0_i32 = arith.constant 0 : i32
    %c0_i32_0 = arith.constant 0 : i32
    return %arg0, %arg1, %c0_i32 : i32, i32, i32
  }
  func.func @transform_1(%arg0: i32, %arg1: i32, %arg2: i32) -> (i32, i32, i32) {
    %c0_i32 = arith.constant 0 : i32
    %c0_i32_0 = arith.constant 0 : i32
    return %arg0, %arg2, %c0_i32 : i32, i32, i32
  }
  func.func @transform_2(%arg0: i32, %arg1: i32, %arg2: i32) -> (i32, i32, i32) {
    %c0_i32 = arith.constant 0 : i32
    %c0_i32_0 = arith.constant 0 : i32
    return %arg0, %arg2, %c0_i32 : i32, i32, i32
  }
  func.func @transform_3(%arg0: i32, %arg1: i32, %arg2: i32) -> (i32, i32, i32) {
    %c0_i32 = arith.constant 0 : i32
    %c0_i32_0 = arith.constant 0 : i32
    return %arg0, %arg1, %c0_i32 : i32, i32, i32
  }
}

module attributes {stable_mosaic.version = 11 : i64} {
  func.func @_matmul_kernel(%arg0: i32, %arg1: i32, %arg2: i32, %arg3: memref<32x128xbf16, #tpu.memory_space<vmem>>, %arg4: memref<128x128xbf16, #tpu.memory_space<vmem>>, %arg5: memref<1x128xf32, #tpu.memory_space<vmem>>, %arg6: memref<32x128xf32, #tpu.memory_space<vmem>>, %arg7: memref<32x128xf32, #tpu.memory_space<vmem>>) attributes {dimension_semantics = [#tpu.dimension_semantics<parallel>, #tpu.dimension_semantics<parallel>, #tpu.dimension_semantics<arbitrary>], iteration_bounds = array<i64: 1, 1, 1>, scalar_prefetch = 0 : i64, scratch_operands = 1 : i64, tpu.core_type = #tpu.core_type<tc>, window_params = [{transform_indices = @transform_0, window_bounds = array<i64: 32, 128>}, {transform_indices = @transform_1, window_bounds = array<i64: 128, 128>}, {transform_indices = @transform_2, window_bounds = array<i64: 1, 128>}, {transform_indices = @transform_3, window_bounds = array<i64: 32, 128>}]} {
    %c0_i32 = arith.constant 0 : i32
    %0 = arith.cmpi eq, %arg2, %c0_i32 : i32
    %1 = arith.extui %0 : i1 to i32
    %c0_i32_0 = arith.constant 0 : i32
    %2 = arith.cmpi ne, %1, %c0_i32_0 : i32
    scf.if %2 {
      %cst_10 = arith.constant 0.000000e+00 : f32
      %12 = vector.broadcast %cst_10 : f32 to vector<32x128xf32>
      %c0_11 = arith.constant 0 : index
      %c0_12 = arith.constant 0 : index
      %13 = vector.load %arg7[%c0_11, %c0_12] : memref<32x128xf32, #tpu.memory_space<vmem>>, vector<32x128xf32>
      tpu.vector_store %arg7[%c0_11, %c0_12], %12 {strides = array<i32>} : memref<32x128xf32, #tpu.memory_space<vmem>>, vector<32x128xf32>,
    } else {
    }
    %c0 = arith.constant 0 : index
    %c0_1 = arith.constant 0 : index
    %3 = vector.load %arg7[%c0, %c0_1] : memref<32x128xf32, #tpu.memory_space<vmem>>, vector<32x128xf32>
    %c0_2 = arith.constant 0 : index
    %c0_3 = arith.constant 0 : index
    %4 = vector.load %arg3[%c0_2, %c0_3] : memref<32x128xbf16, #tpu.memory_space<vmem>>, vector<32x128xbf16>
    %c0_4 = arith.constant 0 : index
    %c0_5 = arith.constant 0 : index
    %5 = vector.load %arg4[%c0_4, %c0_5] : memref<128x128xbf16, #tpu.memory_space<vmem>>, vector<128x128xbf16>
    %cst = arith.constant dense<0.000000e+00> : vector<32x128xf32>
    %6 = tpu.matmul %4, %5, %cst {dimension_numbers = #tpu.dot_dimension_numbers<[1], [0], [0], [1], [0, 0, 1, 1], [], []>} : vector<32x128xbf16>, vector<128x128xbf16>, vector<32x128xf32> -> vector<32x128xf32>
    %7 = arith.addf %3, %6 : vector<32x128xf32>
    %c0_6 = arith.constant 0 : index
    %c0_7 = arith.constant 0 : index
    %8 = vector.load %arg7[%c0_6, %c0_7] : memref<32x128xf32, #tpu.memory_space<vmem>>, vector<32x128xf32>
    tpu.vector_store %arg7[%c0_6, %c0_7], %7 {strides = array<i32>} : memref<32x128xf32, #tpu.memory_space<vmem>>, vector<32x128xf32>,
    %c0_i32_8 = arith.constant 0 : i32
    %9 = arith.cmpi eq, %arg2, %c0_i32_8 : i32
    %10 = arith.extui %9 : i1 to i32
    %c0_i32_9 = arith.constant 0 : i32
    %11 = arith.cmpi ne, %10, %c0_i32_9 : i32
    scf.if %11 {
      %c0_10 = arith.constant 0 : index
      %c0_11 = arith.constant 0 : index
      %12 = vector.load %arg7[%c0_10, %c0_11] : memref<32x128xf32, #tpu.memory_space<vmem>>, vector<32x128xf32>
      %c0_12 = arith.constant 0 : index
      %c0_13 = arith.constant 0 : index
      %13 = vector.load %arg5[%c0_12, %c0_13] : memref<1x128xf32, #tpu.memory_space<vmem>>, vector<1x128xf32>
      %14 = vector.broadcast %13 : vector<1x128xf32> to vector<32x128xf32>
      %15 = arith.addf %12, %14 : vector<32x128xf32>
      %c0_14 = arith.constant 0 : index
      %c0_15 = arith.constant 0 : index
      %16 = vector.load %arg6[%c0_14, %c0_15] : memref<32x128xf32, #tpu.memory_space<vmem>>, vector<32x128xf32>
      tpu.vector_store %arg6[%c0_14, %c0_15], %15 {strides = array<i32>} : memref<32x128xf32, #tpu.memory_space<vmem>>, vector<32x128xf32>,
    } else {
    }
    return
  }
  func.func @transform_0(%arg0: i32, %arg1: i32, %arg2: i32) -> (i32, i32) {
    %c0_i32 = arith.constant 0 : i32
    return %arg0, %arg2 : i32, i32
  }
  func.func @transform_1(%arg0: i32, %arg1: i32, %arg2: i32) -> (i32, i32) {
    %c0_i32 = arith.constant 0 : i32
    return %arg2, %arg1 : i32, i32
  }
  func.func @transform_2(%arg0: i32, %arg1: i32, %arg2: i32) -> (i32, i32) {
    %c0_i32 = arith.constant 0 : i32
    %c0_i32_0 = arith.constant 0 : i32
    return %c0_i32, %arg1 : i32, i32
  }
  func.func @transform_3(%arg0: i32, %arg1: i32, %arg2: i32) -> (i32, i32) {
    %c0_i32 = arith.constant 0 : i32
    return %arg0, %arg1 : i32, i32
  }
}

module attributes {stable_mosaic.version = 11 : i64} {
  func.func @_layernorm_kernel(%arg0: i32, %arg1: memref<32x128xf32, #tpu.memory_space<vmem>>, %arg2: memref<32x128xf32, #tpu.memory_space<vmem>>, %arg3: memref<1x128xf32, #tpu.memory_space<vmem>>, %arg4: memref<1x128xf32, #tpu.memory_space<vmem>>, %arg5: memref<32x128xf32, #tpu.memory_space<vmem>>) attributes {dimension_semantics = [#tpu.dimension_semantics<parallel>], iteration_bounds = array<i64: 1>, scalar_prefetch = 0 : i64, scratch_operands = 0 : i64, tpu.core_type = #tpu.core_type<tc>, window_params = [{transform_indices = @transform_0, window_bounds = array<i64: 32, 128>}, {transform_indices = @transform_1, window_bounds = array<i64: 32, 128>}, {pipeline_mode = #tpu.pipeline_mode<synchronous>, transform_indices = @transform_2, window_bounds = array<i64: 1, 128>}, {pipeline_mode = #tpu.pipeline_mode<synchronous>, transform_indices = @transform_3, window_bounds = array<i64: 1, 128>}, {transform_indices = @transform_4, window_bounds = array<i64: 32, 128>}]} {
    %c0 = arith.constant 0 : index
    %c0_0 = arith.constant 0 : index
    %0 = vector.load %arg1[%c0, %c0_0] : memref<32x128xf32, #tpu.memory_space<vmem>>, vector<32x128xf32>
    %c0_1 = arith.constant 0 : index
    %c0_2 = arith.constant 0 : index
    %1 = vector.load %arg2[%c0_1, %c0_2] : memref<32x128xf32, #tpu.memory_space<vmem>>, vector<32x128xf32>
    %2 = arith.addf %0, %1 : vector<32x128xf32>
    %cst = arith.constant dense<0.000000e+00> : vector<32xf32>
    %3 = vector.multi_reduction <add>, %2, %cst [1] : vector<32x128xf32> to vector<32xf32>
    %4 = vector.shape_cast %3 : vector<32xf32> to vector<32x1xf32>
    %cst_3 = arith.constant 1.280000e+02 : f32
    %5 = vector.broadcast %cst_3 : f32 to vector<32x1xf32>
    %6 = arith.divf %4, %5 : vector<32x1xf32>
    %7 = vector.broadcast %6 : vector<32x1xf32> to vector<32x128xf32>
    %8 = arith.subf %2, %7 : vector<32x128xf32>
    %9 = arith.mulf %8, %8 : vector<32x128xf32>
    %cst_4 = arith.constant dense<0.000000e+00> : vector<32xf32>
    %10 = vector.multi_reduction <add>, %9, %cst_4 [1] : vector<32x128xf32> to vector<32xf32>
    %11 = vector.shape_cast %10 : vector<32xf32> to vector<32x1xf32>
    %cst_5 = arith.constant 1.280000e+02 : f32
    %12 = vector.broadcast %cst_5 : f32 to vector<32x1xf32>
    %13 = arith.divf %11, %12 : vector<32x1xf32>
    %14 = vector.broadcast %6 : vector<32x1xf32> to vector<32x128xf32>
    %15 = arith.subf %2, %14 : vector<32x128xf32>
    %cst_6 = arith.constant 9.99999974E-6 : f32
    %16 = vector.broadcast %cst_6 : f32 to vector<32x1xf32>
    %17 = arith.addf %13, %16 : vector<32x1xf32>
    %18 = math.rsqrt %17 : vector<32x1xf32>
    %19 = vector.broadcast %18 : vector<32x1xf32> to vector<32x128xf32>
    %20 = arith.mulf %15, %19 : vector<32x128xf32>
    %c0_7 = arith.constant 0 : index
    %c0_8 = arith.constant 0 : index
    %21 = vector.load %arg3[%c0_7, %c0_8] : memref<1x128xf32, #tpu.memory_space<vmem>>, vector<1x128xf32>
    %22 = vector.broadcast %21 : vector<1x128xf32> to vector<32x128xf32>
    %23 = arith.mulf %20, %22 : vector<32x128xf32>
    %c0_9 = arith.constant 0 : index
    %c0_10 = arith.constant 0 : index
    %24 = vector.load %arg4[%c0_9, %c0_10] : memref<1x128xf32, #tpu.memory_space<vmem>>, vector<1x128xf32>
    %25 = vector.broadcast %24 : vector<1x128xf32> to vector<32x128xf32>
    %26 = arith.addf %23, %25 : vector<32x128xf32>
    %c0_11 = arith.constant 0 : index
    %c0_12 = arith.constant 0 : index
    %27 = vector.load %arg5[%c0_11, %c0_12] : memref<32x128xf32, #tpu.memory_space<vmem>>, vector<32x128xf32>
    tpu.vector_store %arg5[%c0_11, %c0_12], %26 {strides = array<i32>} : memref<32x128xf32, #tpu.memory_space<vmem>>, vector<32x128xf32>,
    return
  }
  func.func @transform_0(%arg0: i32) -> (i32, i32) {
    %c0_i32 = arith.constant 0 : i32
    %c0_i32_0 = arith.constant 0 : i32
    return %arg0, %c0_i32 : i32, i32
  }
  func.func @transform_1(%arg0: i32) -> (i32, i32) {
    %c0_i32 = arith.constant 0 : i32
    %c0_i32_0 = arith.constant 0 : i32
    return %arg0, %c0_i32 : i32, i32
  }
  func.func @transform_2(%arg0: i32) -> (i32, i32) {
    %c0_i32 = arith.constant 0 : i32
    %c0_i32_0 = arith.constant 0 : i32
    %c0_i32_1 = arith.constant 0 : i32
    return %c0_i32, %c0_i32_0 : i32, i32
  }
  func.func @transform_3(%arg0: i32) -> (i32, i32) {
    %c0_i32 = arith.constant 0 : i32
    %c0_i32_0 = arith.constant 0 : i32
    %c0_i32_1 = arith.constant 0 : i32
    return %c0_i32, %c0_i32_0 : i32, i32
  }
  func.func @transform_4(%arg0: i32) -> (i32, i32) {
    %c0_i32 = arith.constant 0 : i32
    %c0_i32_0 = arith.constant 0 : i32
    return %arg0, %c0_i32 : i32, i32
  }
}

module attributes {stable_mosaic.version = 11 : i64} {
  func.func @_matmul_kernel(%arg0: i32, %arg1: i32, %arg2: i32, %arg3: memref<32x128xf32, #tpu.memory_space<vmem>>, %arg4: memref<128x128xbf16, #tpu.memory_space<vmem>>, %arg5: memref<1x128xf32, #tpu.memory_space<vmem>>, %arg6: memref<32x128xbf16, #tpu.memory_space<vmem>>, %arg7: memref<32x128xf32, #tpu.memory_space<vmem>>) attributes {dimension_semantics = [#tpu.dimension_semantics<parallel>, #tpu.dimension_semantics<parallel>, #tpu.dimension_semantics<arbitrary>], iteration_bounds = array<i64: 1, 1, 1>, scalar_prefetch = 0 : i64, scratch_operands = 1 : i64, tpu.core_type = #tpu.core_type<tc>, window_params = [{transform_indices = @transform_0, window_bounds = array<i64: 32, 128>}, {transform_indices = @transform_1, window_bounds = array<i64: 128, 128>}, {transform_indices = @transform_2, window_bounds = array<i64: 1, 128>}, {transform_indices = @transform_3, window_bounds = array<i64: 32, 128>}]} {
    %c0_i32 = arith.constant 0 : i32
    %0 = arith.cmpi eq, %arg2, %c0_i32 : i32
    %1 = arith.extui %0 : i1 to i32
    %c0_i32_0 = arith.constant 0 : i32
    %2 = arith.cmpi ne, %1, %c0_i32_0 : i32
    scf.if %2 {
      %cst_10 = arith.constant 0.000000e+00 : f32
      %13 = vector.broadcast %cst_10 : f32 to vector<32x128xf32>
      %c0_11 = arith.constant 0 : index
      %c0_12 = arith.constant 0 : index
      %14 = vector.load %arg7[%c0_11, %c0_12] : memref<32x128xf32, #tpu.memory_space<vmem>>, vector<32x128xf32>
      tpu.vector_store %arg7[%c0_11, %c0_12], %13 {strides = array<i32>} : memref<32x128xf32, #tpu.memory_space<vmem>>, vector<32x128xf32>,
    } else {
    }
    %c0 = arith.constant 0 : index
    %c0_1 = arith.constant 0 : index
    %3 = vector.load %arg7[%c0, %c0_1] : memref<32x128xf32, #tpu.memory_space<vmem>>, vector<32x128xf32>
    %c0_2 = arith.constant 0 : index
    %c0_3 = arith.constant 0 : index
    %4 = vector.load %arg3[%c0_2, %c0_3] : memref<32x128xf32, #tpu.memory_space<vmem>>, vector<32x128xf32>
    %5 = arith.truncf %4 : vector<32x128xf32> to vector<32x128xbf16>
    %c0_4 = arith.constant 0 : index
    %c0_5 = arith.constant 0 : index
    %6 = vector.load %arg4[%c0_4, %c0_5] : memref<128x128xbf16, #tpu.memory_space<vmem>>, vector<128x128xbf16>
    %cst = arith.constant dense<0.000000e+00> : vector<32x128xf32>
    %7 = tpu.matmul %5, %6, %cst {dimension_numbers = #tpu.dot_dimension_numbers<[1], [0], [0], [1], [0, 0, 1, 1], [], []>} : vector<32x128xbf16>, vector<128x128xbf16>, vector<32x128xf32> -> vector<32x128xf32>
    %8 = arith.addf %3, %7 : vector<32x128xf32>
    %c0_6 = arith.constant 0 : index
    %c0_7 = arith.constant 0 : index
    %9 = vector.load %arg7[%c0_6, %c0_7] : memref<32x128xf32, #tpu.memory_space<vmem>>, vector<32x128xf32>
    tpu.vector_store %arg7[%c0_6, %c0_7], %8 {strides = array<i32>} : memref<32x128xf32, #tpu.memory_space<vmem>>, vector<32x128xf32>,
    %c0_i32_8 = arith.constant 0 : i32
    %10 = arith.cmpi eq, %arg2, %c0_i32_8 : i32
    %11 = arith.extui %10 : i1 to i32
    %c0_i32_9 = arith.constant 0 : i32
    %12 = arith.cmpi ne, %11, %c0_i32_9 : i32
    scf.if %12 {
      %c0_10 = arith.constant 0 : index
      %c0_11 = arith.constant 0 : index
      %13 = vector.load %arg7[%c0_10, %c0_11] : memref<32x128xf32, #tpu.memory_space<vmem>>, vector<32x128xf32>
      %c0_12 = arith.constant 0 : index
      %c0_13 = arith.constant 0 : index
      %14 = vector.load %arg5[%c0_12, %c0_13] : memref<1x128xf32, #tpu.memory_space<vmem>>, vector<1x128xf32>
      %15 = vector.broadcast %14 : vector<1x128xf32> to vector<32x128xf32>
      %16 = arith.addf %13, %15 : vector<32x128xf32>
      %17 = arith.truncf %16 : vector<32x128xf32> to vector<32x128xbf16>
      %c0_14 = arith.constant 0 : index
      %c0_15 = arith.constant 0 : index
      %18 = vector.load %arg6[%c0_14, %c0_15] : memref<32x128xbf16, #tpu.memory_space<vmem>>, vector<32x128xbf16>
      tpu.vector_store %arg6[%c0_14, %c0_15], %17 {strides = array<i32>} : memref<32x128xbf16, #tpu.memory_space<vmem>>, vector<32x128xbf16>,
    } else {
    }
    return
  }
  func.func @transform_0(%arg0: i32, %arg1: i32, %arg2: i32) -> (i32, i32) {
    %c0_i32 = arith.constant 0 : i32
    return %arg0, %arg2 : i32, i32
  }
  func.func @transform_1(%arg0: i32, %arg1: i32, %arg2: i32) -> (i32, i32) {
    %c0_i32 = arith.constant 0 : i32
    return %arg2, %arg1 : i32, i32
  }
  func.func @transform_2(%arg0: i32, %arg1: i32, %arg2: i32) -> (i32, i32) {
    %c0_i32 = arith.constant 0 : i32
    %c0_i32_0 = arith.constant 0 : i32
    return %c0_i32, %arg1 : i32, i32
  }
  func.func @transform_3(%arg0: i32, %arg1: i32, %arg2: i32) -> (i32, i32) {
    %c0_i32 = arith.constant 0 : i32
    return %arg0, %arg1 : i32, i32
  }
}

module attributes {stable_mosaic.version = 11 : i64} {
  func.func @_layernorm_kernel(%arg0: i32, %arg1: memref<32x128xf32, #tpu.memory_space<vmem>>, %arg2: memref<1x128xf32, #tpu.memory_space<vmem>>, %arg3: memref<1x128xf32, #tpu.memory_space<vmem>>, %arg4: memref<32x128xf32, #tpu.memory_space<vmem>>) attributes {dimension_semantics = [#tpu.dimension_semantics<parallel>], iteration_bounds = array<i64: 1>, scalar_prefetch = 0 : i64, scratch_operands = 0 : i64, tpu.core_type = #tpu.core_type<tc>, window_params = [{transform_indices = @transform_0, window_bounds = array<i64: 32, 128>}, {pipeline_mode = #tpu.pipeline_mode<synchronous>, transform_indices = @transform_1, window_bounds = array<i64: 1, 128>}, {pipeline_mode = #tpu.pipeline_mode<synchronous>, transform_indices = @transform_2, window_bounds = array<i64: 1, 128>}, {transform_indices = @transform_3, window_bounds = array<i64: 32, 128>}]} {
    %c0 = arith.constant 0 : index
    %c0_0 = arith.constant 0 : index
    %0 = vector.load %arg1[%c0, %c0_0] : memref<32x128xf32, #tpu.memory_space<vmem>>, vector<32x128xf32>
    %cst = arith.constant dense<0.000000e+00> : vector<32xf32>
    %1 = vector.multi_reduction <add>, %0, %cst [1] : vector<32x128xf32> to vector<32xf32>
    %2 = vector.shape_cast %1 : vector<32xf32> to vector<32x1xf32>
    %cst_1 = arith.constant 1.280000e+02 : f32
    %3 = vector.broadcast %cst_1 : f32 to vector<32x1xf32>
    %4 = arith.divf %2, %3 : vector<32x1xf32>
    %5 = vector.broadcast %4 : vector<32x1xf32> to vector<32x128xf32>
    %6 = arith.subf %0, %5 : vector<32x128xf32>
    %7 = arith.mulf %6, %6 : vector<32x128xf32>
    %cst_2 = arith.constant dense<0.000000e+00> : vector<32xf32>
    %8 = vector.multi_reduction <add>, %7, %cst_2 [1] : vector<32x128xf32> to vector<32xf32>
    %9 = vector.shape_cast %8 : vector<32xf32> to vector<32x1xf32>
    %cst_3 = arith.constant 1.280000e+02 : f32
    %10 = vector.broadcast %cst_3 : f32 to vector<32x1xf32>
    %11 = arith.divf %9, %10 : vector<32x1xf32>
    %12 = vector.broadcast %4 : vector<32x1xf32> to vector<32x128xf32>
    %13 = arith.subf %0, %12 : vector<32x128xf32>
    %cst_4 = arith.constant 9.99999974E-6 : f32
    %14 = vector.broadcast %cst_4 : f32 to vector<32x1xf32>
    %15 = arith.addf %11, %14 : vector<32x1xf32>
    %16 = math.rsqrt %15 : vector<32x1xf32>
    %17 = vector.broadcast %16 : vector<32x1xf32> to vector<32x128xf32>
    %18 = arith.mulf %13, %17 : vector<32x128xf32>
    %c0_5 = arith.constant 0 : index
    %c0_6 = arith.constant 0 : index
    %19 = vector.load %arg2[%c0_5, %c0_6] : memref<1x128xf32, #tpu.memory_space<vmem>>, vector<1x128xf32>
    %20 = vector.broadcast %19 : vector<1x128xf32> to vector<32x128xf32>
    %21 = arith.mulf %18, %20 : vector<32x128xf32>
    %c0_7 = arith.constant 0 : index
    %c0_8 = arith.constant 0 : index
    %22 = vector.load %arg3[%c0_7, %c0_8] : memref<1x128xf32, #tpu.memory_space<vmem>>, vector<1x128xf32>
    %23 = vector.broadcast %22 : vector<1x128xf32> to vector<32x128xf32>
    %24 = arith.addf %21, %23 : vector<32x128xf32>
    %c0_9 = arith.constant 0 : index
    %c0_10 = arith.constant 0 : index
    %25 = vector.load %arg4[%c0_9, %c0_10] : memref<32x128xf32, #tpu.memory_space<vmem>>, vector<32x128xf32>
    tpu.vector_store %arg4[%c0_9, %c0_10], %24 {strides = array<i32>} : memref<32x128xf32, #tpu.memory_space<vmem>>, vector<32x128xf32>,
    return
  }
  func.func @transform_0(%arg0: i32) -> (i32, i32) {
    %c0_i32 = arith.constant 0 : i32
    %c0_i32_0 = arith.constant 0 : i32
    return %arg0, %c0_i32 : i32, i32
  }
  func.func @transform_1(%arg0: i32) -> (i32, i32) {
    %c0_i32 = arith.constant 0 : i32
    %c0_i32_0 = arith.constant 0 : i32
    %c0_i32_1 = arith.constant 0 : i32
    return %c0_i32, %c0_i32_0 : i32, i32
  }
  func.func @transform_2(%arg0: i32) -> (i32, i32) {
    %c0_i32 = arith.constant 0 : i32
    %c0_i32_0 = arith.constant 0 : i32
    %c0_i32_1 = arith.constant 0 : i32
    return %c0_i32, %c0_i32_0 : i32, i32
  }
  func.func @transform_3(%arg0: i32) -> (i32, i32) {
    %c0_i32 = arith.constant 0 : i32
    %c0_i32_0 = arith.constant 0 : i32
    return %arg0, %c0_i32 : i32, i32
  }
}

module attributes {stable_mosaic.version = 11 : i64} {
  func.func @_ffn_kernel(%arg0: i32, %arg1: i32, %arg2: memref<32x128xf32, #tpu.memory_space<vmem>>, %arg3: memref<128x256xbf16, #tpu.memory_space<vmem>>, %arg4: memref<1x256xf32, #tpu.memory_space<vmem>>, %arg5: memref<256x128xbf16, #tpu.memory_space<vmem>>, %arg6: memref<1x128xf32, #tpu.memory_space<vmem>>, %arg7: memref<32x128xf32, #tpu.memory_space<vmem>>, %arg8: memref<32x128xf32, #tpu.memory_space<vmem>>) attributes {dimension_semantics = [#tpu.dimension_semantics<parallel>, #tpu.dimension_semantics<arbitrary>], iteration_bounds = array<i64: 1, 1>, scalar_prefetch = 0 : i64, scratch_operands = 1 : i64, tpu.core_type = #tpu.core_type<tc>, window_params = [{transform_indices = @transform_0, window_bounds = array<i64: 32, 128>}, {transform_indices = @transform_1, window_bounds = array<i64: 128, 256>}, {transform_indices = @transform_2, window_bounds = array<i64: 1, 256>}, {transform_indices = @transform_3, window_bounds = array<i64: 256, 128>}, {pipeline_mode = #tpu.pipeline_mode<synchronous>, transform_indices = @transform_4, window_bounds = array<i64: 1, 128>}, {transform_indices = @transform_5, window_bounds = array<i64: 32, 128>}]} {
    %c0_i32 = arith.constant 0 : i32
    %0 = arith.cmpi eq, %arg1, %c0_i32 : i32
    %1 = arith.extui %0 : i1 to i32
    %c0_i32_0 = arith.constant 0 : i32
    %2 = arith.cmpi ne, %1, %c0_i32_0 : i32
    scf.if %2 {
      %cst_16 = arith.constant 0.000000e+00 : f32
      %21 = vector.broadcast %cst_16 : f32 to vector<32x128xf32>
      %c0_17 = arith.constant 0 : index
      %c0_18 = arith.constant 0 : index
      %22 = vector.load %arg8[%c0_17, %c0_18] : memref<32x128xf32, #tpu.memory_space<vmem>>, vector<32x128xf32>
      tpu.vector_store %arg8[%c0_17, %c0_18], %21 {strides = array<i32>} : memref<32x128xf32, #tpu.memory_space<vmem>>, vector<32x128xf32>,
    } else {
    }
    %c0 = arith.constant 0 : index
    %c0_1 = arith.constant 0 : index
    %3 = vector.load %arg2[%c0, %c0_1] : memref<32x128xf32, #tpu.memory_space<vmem>>, vector<32x128xf32>
    %4 = arith.truncf %3 : vector<32x128xf32> to vector<32x128xbf16>
    %c0_2 = arith.constant 0 : index
    %c0_3 = arith.constant 0 : index
    %5 = vector.load %arg3[%c0_2, %c0_3] : memref<128x256xbf16, #tpu.memory_space<vmem>>, vector<128x256xbf16>
    %cst = arith.constant dense<0.000000e+00> : vector<32x256xf32>
    %6 = tpu.matmul %4, %5, %cst {dimension_numbers = #tpu.dot_dimension_numbers<[1], [0], [0], [1], [0, 0, 1, 1], [], []>} : vector<32x128xbf16>, vector<128x256xbf16>, vector<32x256xf32> -> vector<32x256xf32>
    %c0_4 = arith.constant 0 : index
    %c0_5 = arith.constant 0 : index
    %7 = vector.load %arg4[%c0_4, %c0_5] : memref<1x256xf32, #tpu.memory_space<vmem>>, vector<1x256xf32>
    %8 = vector.broadcast %7 : vector<1x256xf32> to vector<32x256xf32>
    %9 = arith.addf %6, %8 : vector<32x256xf32>
    %cst_6 = arith.constant 0.000000e+00 : f32
    %10 = vector.broadcast %cst_6 : f32 to vector<32x256xf32>
    %11 = arith.maximumf %9, %10 : vector<32x256xf32>
    %c0_7 = arith.constant 0 : index
    %c0_8 = arith.constant 0 : index
    %12 = vector.load %arg8[%c0_7, %c0_8] : memref<32x128xf32, #tpu.memory_space<vmem>>, vector<32x128xf32>
    %13 = arith.truncf %11 : vector<32x256xf32> to vector<32x256xbf16>
    %c0_9 = arith.constant 0 : index
    %c0_10 = arith.constant 0 : index
    %14 = vector.load %arg5[%c0_9, %c0_10] : memref<256x128xbf16, #tpu.memory_space<vmem>>, vector<256x128xbf16>
    %cst_11 = arith.constant dense<0.000000e+00> : vector<32x128xf32>
    %15 = tpu.matmul %13, %14, %cst_11 {dimension_numbers = #tpu.dot_dimension_numbers<[1], [0], [0], [1], [0, 0, 1, 1], [], []>} : vector<32x256xbf16>, vector<256x128xbf16>, vector<32x128xf32> -> vector<32x128xf32>
    %16 = arith.addf %12, %15 : vector<32x128xf32>
    %c0_12 = arith.constant 0 : index
    %c0_13 = arith.constant 0 : index
    %17 = vector.load %arg8[%c0_12, %c0_13] : memref<32x128xf32, #tpu.memory_space<vmem>>, vector<32x128xf32>
    tpu.vector_store %arg8[%c0_12, %c0_13], %16 {strides = array<i32>} : memref<32x128xf32, #tpu.memory_space<vmem>>, vector<32x128xf32>,
    %c0_i32_14 = arith.constant 0 : i32
    %18 = arith.cmpi eq, %arg1, %c0_i32_14 : i32
    %19 = arith.extui %18 : i1 to i32
    %c0_i32_15 = arith.constant 0 : i32
    %20 = arith.cmpi ne, %19, %c0_i32_15 : i32
    scf.if %20 {
      %c0_16 = arith.constant 0 : index
      %c0_17 = arith.constant 0 : index
      %21 = vector.load %arg8[%c0_16, %c0_17] : memref<32x128xf32, #tpu.memory_space<vmem>>, vector<32x128xf32>
      %c0_18 = arith.constant 0 : index
      %c0_19 = arith.constant 0 : index
      %22 = vector.load %arg6[%c0_18, %c0_19] : memref<1x128xf32, #tpu.memory_space<vmem>>, vector<1x128xf32>
      %23 = vector.broadcast %22 : vector<1x128xf32> to vector<32x128xf32>
      %24 = arith.addf %21, %23 : vector<32x128xf32>
      %c0_20 = arith.constant 0 : index
      %c0_21 = arith.constant 0 : index
      %25 = vector.load %arg7[%c0_20, %c0_21] : memref<32x128xf32, #tpu.memory_space<vmem>>, vector<32x128xf32>
      tpu.vector_store %arg7[%c0_20, %c0_21], %24 {strides = array<i32>} : memref<32x128xf32, #tpu.memory_space<vmem>>, vector<32x128xf32>,
    } else {
    }
    return
  }
  func.func @transform_0(%arg0: i32, %arg1: i32) -> (i32, i32) {
    %c0_i32 = arith.constant 0 : i32
    %c0_i32_0 = arith.constant 0 : i32
    return %arg0, %c0_i32 : i32, i32
  }
  func.func @transform_1(%arg0: i32, %arg1: i32) -> (i32, i32) {
    %c0_i32 = arith.constant 0 : i32
    %c0_i32_0 = arith.constant 0 : i32
    return %c0_i32, %arg1 : i32, i32
  }
  func.func @transform_2(%arg0: i32, %arg1: i32) -> (i32, i32) {
    %c0_i32 = arith.constant 0 : i32
    %c0_i32_0 = arith.constant 0 : i32
    return %c0_i32, %arg1 : i32, i32
  }
  func.func @transform_3(%arg0: i32, %arg1: i32) -> (i32, i32) {
    %c0_i32 = arith.constant 0 : i32
    %c0_i32_0 = arith.constant 0 : i32
    return %arg1, %c0_i32 : i32, i32
  }
  func.func @transform_4(%arg0: i32, %arg1: i32) -> (i32, i32) {
    %c0_i32 = arith.constant 0 : i32
    %c0_i32_0 = arith.constant 0 : i32
    %c0_i32_1 = arith.constant 0 : i32
    return %c0_i32, %c0_i32_0 : i32, i32
  }
  func.func @transform_5(%arg0: i32, %arg1: i32) -> (i32, i32) {
    %c0_i32 = arith.constant 0 : i32
    %c0_i32_0 = arith.constant 0 : i32
    return %arg0, %c0_i32 : i32, i32
  }
}

module attributes {stable_mosaic.version = 11 : i64} {
  func.func @_matmul_kernel(%arg0: i32, %arg1: i32, %arg2: i32, %arg3: memref<32x128xf32, #tpu.memory_space<vmem>>, %arg4: memref<128x256xbf16, #tpu.memory_space<vmem>>, %arg5: memref<1x256xf32, #tpu.memory_space<vmem>>, %arg6: memref<32x256xbf16, #tpu.memory_space<vmem>>, %arg7: memref<32x256xf32, #tpu.memory_space<vmem>>) attributes {dimension_semantics = [#tpu.dimension_semantics<parallel>, #tpu.dimension_semantics<parallel>, #tpu.dimension_semantics<arbitrary>], iteration_bounds = array<i64: 1, 1, 1>, scalar_prefetch = 0 : i64, scratch_operands = 1 : i64, tpu.core_type = #tpu.core_type<tc>, window_params = [{transform_indices = @transform_0, window_bounds = array<i64: 32, 128>}, {transform_indices = @transform_1, window_bounds = array<i64: 128, 256>}, {transform_indices = @transform_2, window_bounds = array<i64: 1, 256>}, {transform_indices = @transform_3, window_bounds = array<i64: 32, 256>}]} {
    %c0_i32 = arith.constant 0 : i32
    %0 = arith.cmpi eq, %arg2, %c0_i32 : i32
    %1 = arith.extui %0 : i1 to i32
    %c0_i32_0 = arith.constant 0 : i32
    %2 = arith.cmpi ne, %1, %c0_i32_0 : i32
    scf.if %2 {
      %cst_10 = arith.constant 0.000000e+00 : f32
      %13 = vector.broadcast %cst_10 : f32 to vector<32x256xf32>
      %c0_11 = arith.constant 0 : index
      %c0_12 = arith.constant 0 : index
      %14 = vector.load %arg7[%c0_11, %c0_12] : memref<32x256xf32, #tpu.memory_space<vmem>>, vector<32x256xf32>
      tpu.vector_store %arg7[%c0_11, %c0_12], %13 {strides = array<i32>} : memref<32x256xf32, #tpu.memory_space<vmem>>, vector<32x256xf32>,
    } else {
    }
    %c0 = arith.constant 0 : index
    %c0_1 = arith.constant 0 : index
    %3 = vector.load %arg7[%c0, %c0_1] : memref<32x256xf32, #tpu.memory_space<vmem>>, vector<32x256xf32>
    %c0_2 = arith.constant 0 : index
    %c0_3 = arith.constant 0 : index
    %4 = vector.load %arg3[%c0_2, %c0_3] : memref<32x128xf32, #tpu.memory_space<vmem>>, vector<32x128xf32>
    %5 = arith.truncf %4 : vector<32x128xf32> to vector<32x128xbf16>
    %c0_4 = arith.constant 0 : index
    %c0_5 = arith.constant 0 : index
    %6 = vector.load %arg4[%c0_4, %c0_5] : memref<128x256xbf16, #tpu.memory_space<vmem>>, vector<128x256xbf16>
    %cst = arith.constant dense<0.000000e+00> : vector<32x256xf32>
    %7 = tpu.matmul %5, %6, %cst {dimension_numbers = #tpu.dot_dimension_numbers<[1], [0], [0], [1], [0, 0, 1, 1], [], []>} : vector<32x128xbf16>, vector<128x256xbf16>, vector<32x256xf32> -> vector<32x256xf32>
    %8 = arith.addf %3, %7 : vector<32x256xf32>
    %c0_6 = arith.constant 0 : index
    %c0_7 = arith.constant 0 : index
    %9 = vector.load %arg7[%c0_6, %c0_7] : memref<32x256xf32, #tpu.memory_space<vmem>>, vector<32x256xf32>
    tpu.vector_store %arg7[%c0_6, %c0_7], %8 {strides = array<i32>} : memref<32x256xf32, #tpu.memory_space<vmem>>, vector<32x256xf32>,
    %c0_i32_8 = arith.constant 0 : i32
    %10 = arith.cmpi eq, %arg2, %c0_i32_8 : i32
    %11 = arith.extui %10 : i1 to i32
    %c0_i32_9 = arith.constant 0 : i32
    %12 = arith.cmpi ne, %11, %c0_i32_9 : i32
    scf.if %12 {
      %c0_10 = arith.constant 0 : index
      %c0_11 = arith.constant 0 : index
      %13 = vector.load %arg7[%c0_10, %c0_11] : memref<32x256xf32, #tpu.memory_space<vmem>>, vector<32x256xf32>
      %c0_12 = arith.constant 0 : index
      %c0_13 = arith.constant 0 : index
      %14 = vector.load %arg5[%c0_12, %c0_13] : memref<1x256xf32, #tpu.memory_space<vmem>>, vector<1x256xf32>
      %15 = vector.broadcast %14 : vector<1x256xf32> to vector<32x256xf32>
      %16 = arith.addf %13, %15 : vector<32x256xf32>
      %17 = arith.truncf %16 : vector<32x256xf32> to vector<32x256xbf16>
      %c0_14 = arith.constant 0 : index
      %c0_15 = arith.constant 0 : index
      %18 = vector.load %arg6[%c0_14, %c0_15] : memref<32x256xbf16, #tpu.memory_space<vmem>>, vector<32x256xbf16>
      tpu.vector_store %arg6[%c0_14, %c0_15], %17 {strides = array<i32>} : memref<32x256xbf16, #tpu.memory_space<vmem>>, vector<32x256xbf16>,
    } else {
    }
    return
  }
  func.func @transform_0(%arg0: i32, %arg1: i32, %arg2: i32) -> (i32, i32) {
    %c0_i32 = arith.constant 0 : i32
    return %arg0, %arg2 : i32, i32
  }
  func.func @transform_1(%arg0: i32, %arg1: i32, %arg2: i32) -> (i32, i32) {
    %c0_i32 = arith.constant 0 : i32
    return %arg2, %arg1 : i32, i32
  }
  func.func @transform_2(%arg0: i32, %arg1: i32, %arg2: i32) -> (i32, i32) {
    %c0_i32 = arith.constant 0 : i32
    %c0_i32_0 = arith.constant 0 : i32
    return %c0_i32, %arg1 : i32, i32
  }
  func.func @transform_3(%arg0: i32, %arg1: i32, %arg2: i32) -> (i32, i32) {
    %c0_i32 = arith.constant 0 : i32
    return %arg0, %arg1 : i32, i32
  }
}

module attributes {stable_mosaic.version = 11 : i64} {
  func.func @_matmul_kernel(%arg0: i32, %arg1: i32, %arg2: i32, %arg3: memref<32x128xf32, #tpu.memory_space<vmem>>, %arg4: memref<128x256xbf16, #tpu.memory_space<vmem>>, %arg5: memref<1x256xf32, #tpu.memory_space<vmem>>, %arg6: memref<32x256xf32, #tpu.memory_space<vmem>>, %arg7: memref<32x256xf32, #tpu.memory_space<vmem>>) attributes {dimension_semantics = [#tpu.dimension_semantics<parallel>, #tpu.dimension_semantics<parallel>, #tpu.dimension_semantics<arbitrary>], iteration_bounds = array<i64: 1, 1, 1>, scalar_prefetch = 0 : i64, scratch_operands = 1 : i64, tpu.core_type = #tpu.core_type<tc>, window_params = [{transform_indices = @transform_0, window_bounds = array<i64: 32, 128>}, {transform_indices = @transform_1, window_bounds = array<i64: 128, 256>}, {transform_indices = @transform_2, window_bounds = array<i64: 1, 256>}, {transform_indices = @transform_3, window_bounds = array<i64: 32, 256>}]} {
    %c0_i32 = arith.constant 0 : i32
    %0 = arith.cmpi eq, %arg2, %c0_i32 : i32
    %1 = arith.extui %0 : i1 to i32
    %c0_i32_0 = arith.constant 0 : i32
    %2 = arith.cmpi ne, %1, %c0_i32_0 : i32
    scf.if %2 {
      %cst_10 = arith.constant 0.000000e+00 : f32
      %13 = vector.broadcast %cst_10 : f32 to vector<32x256xf32>
      %c0_11 = arith.constant 0 : index
      %c0_12 = arith.constant 0 : index
      %14 = vector.load %arg7[%c0_11, %c0_12] : memref<32x256xf32, #tpu.memory_space<vmem>>, vector<32x256xf32>
      tpu.vector_store %arg7[%c0_11, %c0_12], %13 {strides = array<i32>} : memref<32x256xf32, #tpu.memory_space<vmem>>, vector<32x256xf32>,
    } else {
    }
    %c0 = arith.constant 0 : index
    %c0_1 = arith.constant 0 : index
    %3 = vector.load %arg7[%c0, %c0_1] : memref<32x256xf32, #tpu.memory_space<vmem>>, vector<32x256xf32>
    %c0_2 = arith.constant 0 : index
    %c0_3 = arith.constant 0 : index
    %4 = vector.load %arg3[%c0_2, %c0_3] : memref<32x128xf32, #tpu.memory_space<vmem>>, vector<32x128xf32>
    %5 = arith.truncf %4 : vector<32x128xf32> to vector<32x128xbf16>
    %c0_4 = arith.constant 0 : index
    %c0_5 = arith.constant 0 : index
    %6 = vector.load %arg4[%c0_4, %c0_5] : memref<128x256xbf16, #tpu.memory_space<vmem>>, vector<128x256xbf16>
    %cst = arith.constant dense<0.000000e+00> : vector<32x256xf32>
    %7 = tpu.matmul %5, %6, %cst {dimension_numbers = #tpu.dot_dimension_numbers<[1], [0], [0], [1], [0, 0, 1, 1], [], []>} : vector<32x128xbf16>, vector<128x256xbf16>, vector<32x256xf32> -> vector<32x256xf32>
    %8 = arith.addf %3, %7 : vector<32x256xf32>
    %c0_6 = arith.constant 0 : index
    %c0_7 = arith.constant 0 : index
    %9 = vector.load %arg7[%c0_6, %c0_7] : memref<32x256xf32, #tpu.memory_space<vmem>>, vector<32x256xf32>
    tpu.vector_store %arg7[%c0_6, %c0_7], %8 {strides = array<i32>} : memref<32x256xf32, #tpu.memory_space<vmem>>, vector<32x256xf32>,
    %c0_i32_8 = arith.constant 0 : i32
    %10 = arith.cmpi eq, %arg2, %c0_i32_8 : i32
    %11 = arith.extui %10 : i1 to i32
    %c0_i32_9 = arith.constant 0 : i32
    %12 = arith.cmpi ne, %11, %c0_i32_9 : i32
    scf.if %12 {
      %c0_10 = arith.constant 0 : index
      %c0_11 = arith.constant 0 : index
      %13 = vector.load %arg7[%c0_10, %c0_11] : memref<32x256xf32, #tpu.memory_space<vmem>>, vector<32x256xf32>
      %c0_12 = arith.constant 0 : index
      %c0_13 = arith.constant 0 : index
      %14 = vector.load %arg5[%c0_12, %c0_13] : memref<1x256xf32, #tpu.memory_space<vmem>>, vector<1x256xf32>
      %15 = vector.broadcast %14 : vector<1x256xf32> to vector<32x256xf32>
      %16 = arith.addf %13, %15 : vector<32x256xf32>
      %c0_14 = arith.constant 0 : index
      %c0_15 = arith.constant 0 : index
      %17 = vector.load %arg6[%c0_14, %c0_15] : memref<32x256xf32, #tpu.memory_space<vmem>>, vector<32x256xf32>
      tpu.vector_store %arg6[%c0_14, %c0_15], %16 {strides = array<i32>} : memref<32x256xf32, #tpu.memory_space<vmem>>, vector<32x256xf32>,
    } else {
    }
    return
  }
  func.func @transform_0(%arg0: i32, %arg1: i32, %arg2: i32) -> (i32, i32) {
    %c0_i32 = arith.constant 0 : i32
    return %arg0, %arg2 : i32, i32
  }
  func.func @transform_1(%arg0: i32, %arg1: i32, %arg2: i32) -> (i32, i32) {
    %c0_i32 = arith.constant 0 : i32
    return %arg2, %arg1 : i32, i32
  }
  func.func @transform_2(%arg0: i32, %arg1: i32, %arg2: i32) -> (i32, i32) {
    %c0_i32 = arith.constant 0 : i32
    %c0_i32_0 = arith.constant 0 : i32
    return %c0_i32, %arg1 : i32, i32
  }
  func.func @transform_3(%arg0: i32, %arg1: i32, %arg2: i32) -> (i32, i32) {
    %c0_i32 = arith.constant 0 : i32
    return %arg0, %arg1 : i32, i32
  }
}

</mosaic_0001>

<bundles_post_ra>
// kernel: _lambda_.53
= control target key start
LH: loop header
LB: loop body
LE: loop exit
PB: predicated region body
PF: predicated region fallthrough
CT: control target
= control target key end

     0   :  { %s181_s0 = inlined_call_operand.vmem [shape: f32[32,128], index: 0, kind: input, shape index: {}]   ;;  %s182_s1 = inlined_call_operand.vmem [shape: f32[32,128], index: 1, kind: input, shape index: {}]   ;;  %s183_s2 = inlined_call_operand.vmem [shape: f32[1,128], index: 2, kind: input, shape index: {}]   ;;  %s184_s3 = inlined_call_operand.vmem [shape: f32[1,128], index: 3, kind: input, shape index: {}]   ;;  %s185_s4 = inlined_call_operand.vmem [shape: f32[32,128], index: 4, kind: output, shape index: {}]  }
   0x1   :  { %v17_v0 = vld [vmem:[%s181_s0] sm:$0xff]  ;;  %v19_v2 = vld [vmem:[%s181_s0 + $0x10] sm:$0xff]  ;;  %v18_v5 = vld [vmem:[%s181_s0 + $0x8] sm:$0xff] }
   0x2   :  { %v21_v1 = vld [vmem:[%s182_s1] sm:$0xff]  ;;  %v23_v4 = vld [vmem:[%s182_s1 + $0x10] sm:$0xff]  ;;  %v22_v6 = vld [vmem:[%s182_s1 + $0x8] sm:$0xff] }
   0x3   :  { %v25_v3 = vadd.f32 %v21_v1, %v17_v0  ;;  %v27_v7 = vadd.f32 %v23_v4, %v19_v2  ;;  %v20_v8 = vld [vmem:[%s181_s0 + $0x18] sm:$0xff]  ;;  %v26_v10 = vadd.f32 %v22_v6, %v18_v5  ;;  %v104_v41 = vld [vmem:[%s183_s2] ss:$0 sm:$0xff] }
   0x4   :  { %v24_v9 = vld [vmem:[%s182_s1 + $0x18] sm:$0xff]  ;;  %v105_v43 = vld [vmem:[%s184_s3] ss:$0 sm:$0xff] }
   0x5   :  { %29 = vadd.xlane.f32.xlu0 %v25_v3  ;;  %33 = vadd.xlane.f32.xlu1 %v27_v7  ;;  %v28_v11 = vadd.f32 %v24_v9, %v20_v8 }
   0x9   :  { %31 = vadd.xlane.f32.xlu0 %v26_v10  ;;  %35 = vadd.xlane.f32.xlu1 %v28_v11 }
  0x92   :  { %v30_v12 = vpop.xlane.xlu0 %29  ;;  %v34_v14 = vpop.xlane.xlu1 %33 }
  0x93   :  { %v38_v13 = vmul.f32 0.0078125, %v30_v12  ;;  %v40_v15 = vmul.f32 0.0078125, %v34_v14 }
  0x95   :  { %v42_v16 = vsub.f32 %v25_v3, %v38_v13  ;;  %v44_v17 = vsub.f32 %v27_v7, %v40_v15 }
  0x96   :  { %v32_v18 = vpop.xlane.xlu0 %31  ;;  %v36_v21 = vpop.xlane.xlu1 %35 }
  0x97   :  { %v39_v19 = vmul.f32 0.0078125, %v32_v18  ;;  %v46_v20 = vmul.f32 %v42_v16, %v42_v16  ;;  %v41_v22 = vmul.f32 0.0078125, %v36_v21  ;;  %v48_v24 = vmul.f32 %v44_v17, %v44_v17 }
  0x99   :  { %v43_v23 = vsub.f32 %v26_v10, %v39_v19  ;;  %50 = vadd.xlane.f32.xlu0 %v46_v20  ;;  %v45_v25 = vsub.f32 %v28_v11, %v41_v22 }
  0x9b   :  { %v47_v26 = vmul.f32 %v43_v23, %v43_v23  ;;  %v49_v27 = vmul.f32 %v45_v25, %v45_v25 }
  0x9d   :  { %54 = vadd.xlane.f32.xlu0 %v48_v24  ;;  %52 = vadd.xlane.f32.xlu1 %v47_v26 }
  0xa1   :  { %56 = vadd.xlane.f32.xlu1 %v49_v27 }
 0x126   :  { %v51_v28 = vpop.xlane.xlu0 %50 }
 0x127   :  { %v58_v29 = vmul.f32 0.0078125, %v51_v28 }
 0x129   :  { %v62_v30 = vadd.f32 1e-05, %v58_v29 }
 0x12a   :  { %v53_v31 = vpop.xlane.xlu1 %52  ;;  %v55_v32 = vpop.xlane.xlu0 %54 }
 0x12b   :  { %106 = vrsqrt.f32 %v62_v30  ;;  %v59_v33 = vmul.f32 0.0078125, %v53_v31  ;;  %v60_v34 = vmul.f32 0.0078125, %v55_v32 }
 0x12d   :  { %v63_v35 = vadd.f32 1e-05, %v59_v33  ;;  %v64_v36 = vadd.f32 1e-05, %v60_v34 }
 0x12e   :  { %v57_v37 = vpop.xlane.xlu1 %56 }
 0x12f   :  { %108 = vrsqrt.f32 %v63_v35  ;;  %v61_v38 = vmul.f32 0.0078125, %v57_v37 }
 0x130   :  { %110 = vrsqrt.f32 %v64_v36 }
 0x131   :  { %v65_v39 = vadd.f32 1e-05, %v61_v38 }
 0x133   :  { %112 = vrsqrt.f32 %v65_v39 }
 0x135   :  { %v107_v40 = vpop.eup %106 }
 0x136   :  { %v70_v42 = vmul.f32 %v107_v40, %v42_v16 }
 0x138   :  { %v81_v44 = vmul.f32 %v104_v41, %v70_v42 }
 0x139   :  { %v109_v45 = vpop.eup %108 }
 0x13a   :  { %v111_v46 = vpop.eup %110  ;;  %v92_v47 = vadd.f32 %v105_v43, %v81_v44  ;;  %v71_v48 = vmul.f32 %v109_v45, %v43_v23 }
 0x13b   :  { %v72_v49 = vmul.f32 %v111_v46, %v44_v17 }
 0x13c   :  { %96 = vst [vmem:[%s185_s4] sm:$0xff] %v92_v47  ;;  %v82_v50 = vmul.f32 %v104_v41, %v71_v48 }
 0x13d   :  { %v113_v51 = vpop.eup %112  ;;  %v83_v52 = vmul.f32 %v104_v41, %v72_v49 }
 0x13e   :  { %v93_v53 = vadd.f32 %v105_v43, %v82_v50  ;;  %v73_v54 = vmul.f32 %v113_v51, %v45_v25 }
 0x13f   :  { %v94_v55 = vadd.f32 %v105_v43, %v83_v52 }
 0x140   :  { %97 = vst [vmem:[%s185_s4 + $0x8] sm:$0xff] %v93_v53  ;;  %v84_v56 = vmul.f32 %v104_v41, %v73_v54 }
 0x141   :  { %98 = vst [vmem:[%s185_s4 + $0x10] sm:$0xff] %v94_v55 }
 0x142   :  { %v95_v57 = vadd.f32 %v105_v43, %v84_v56 }
 0x144   :  { %99 = vst [vmem:[%s185_s4 + $0x18] sm:$0xff] %v95_v57 }

// kernel: _lambda_.52
= control target key start
LH: loop header
LB: loop body
LE: loop exit
PB: predicated region body
PF: predicated region fallthrough
CT: control target
= control target key end

     0   :  { %s306_s1 = inlined_call_operand.vmem [shape: bf16[128,128], index: 1, kind: input, shape index: {}]   ;;  %s307_s0 = inlined_call_operand.vmem [shape: bf16[32,128], index: 0, kind: input, shape index: {}]   ;;  %s308_s2 = inlined_call_operand.vmem [shape: f32[1,128], index: 2, kind: input, shape index: {}]   ;;  %s309_s3 = inlined_call_operand.vmem [shape: f32[32,128], index: 3, kind: output, shape index: {}]  }
   0x1   :  { %v231_v0 = vld [vmem:[%s306_s1] sm:$0xff]   ;;  %v232_v1 = vld [vmem:[%s306_s1 + $0x8] sm:$0xff]   ;;  %v233_v2 = vld [vmem:[%s306_s1 + $0x10] sm:$0xff]  }
   0x2   :  { %211 = vmatprep.subr.bf16.mxu0 %v231_v0  ;;  %v234_v3 = vld [vmem:[%s306_s1 + $0x18] sm:$0xff]   ;;  %v239_v4 = vld [vmem:[%s307_s0] sm:$0xff]   ;;  %v236_v6 = vld [vmem:[%s306_s1 + $0x28] sm:$0xff]  }
   0x3   :  { %212 = vmatpush3.bf16.msra.mxu0 %v231_v0  ;;  %227 = vmatprep.mubr.bf16.mxu0 %v239_v4  ;;  %v235_v5 = vld [vmem:[%s306_s1 + $0x20] sm:$0xff]   ;;  %v237_v7 = vld [vmem:[%s306_s1 + $0x30] sm:$0xff]   ;;  %v238_v8 = vld [vmem:[%s306_s1 + $0x38] sm:$0xff]  }
   0x4   :  { %213 = vmatprep.subr.bf16.mxu0 %v232_v1  ;;  %v240_v9 = vld [vmem:[%s307_s0 + $0x8] sm:$0xff]   ;;  %v200_v10 = vld [vmem:[%s308_s2] ss:$0 sm:$0xff] }
   0x7   :  { %214 = vmatpush3.bf16.msra.mxu0 %v232_v1 }
   0x8   :  { %215 = vmatprep.subr.bf16.mxu0 %v233_v2 }
   0xb   :  { %216 = vmatpush3.bf16.msra.mxu0 %v233_v2 }
   0xc   :  { %217 = vmatprep.subr.bf16.mxu0 %v234_v3 }
   0xf   :  { %218 = vmatpush3.bf16.msra.mxu0 %v234_v3 }
  0x10   :  { %219 = vmatprep.subr.bf16.mxu0 %v235_v5 }
  0x13   :  { %220 = vmatpush3.bf16.msra.mxu0 %v235_v5 }
  0x14   :  { %221 = vmatprep.subr.bf16.mxu0 %v236_v6 }
  0x17   :  { %222 = vmatpush3.bf16.msra.mxu0 %v236_v6 }
  0x18   :  { %223 = vmatprep.subr.bf16.mxu0 %v237_v7 }
  0x1b   :  { %224 = vmatpush3.bf16.msra.mxu0 %v237_v7 }
  0x1c   :  { %225 = vmatprep.subr.bf16.mxu0 %v238_v8 }
  0x1f   :  { %226 = vmatpush3.bf16.msra.mxu0 %v238_v8 }
  0x22   :  { %228 = vmatmul.mubr.bf16.vlgmr.msra.gmra.mrb[0].mxu0 %v240_v9 }
  0xf5   :  { %v229_v11 = vpop.f32.mrb[0].mxu0 }
  0xf6   :  { %v180_v12 = vadd.f32 %v229_v11, %v200_v10  ;;  %v141_v13 = vpop.f32.mrb[1].mxu0 }
  0xf7   :  { %v178_v14 = vadd.f32 %v200_v10, %v141_v13  ;;  %v230_v15 = vpop.f32.mrb[2].mxu0 }
  0xf8   :  { %184 = vst [vmem:[%s309_s3 + $0x10] sm:$0xff] %v180_v12  ;;  %v181_v16 = vadd.f32 %v230_v15, %v200_v10  ;;  %v144_v17 = vpop.f32.mrb[3].mxu0 }
  0xf9   :  { %182 = vst [vmem:[%s309_s3] sm:$0xff] %v178_v14  ;;  %v179_v18 = vadd.f32 %v200_v10, %v144_v17 }
  0xfa   :  { %185 = vst [vmem:[%s309_s3 + $0x18] sm:$0xff] %v181_v16 }
  0xfb   :  { %183 = vst [vmem:[%s309_s3 + $0x8] sm:$0xff] %v179_v18 }

// kernel: _lambda_.51
= control target key start
LH: loop header
LB: loop body
LE: loop exit
PB: predicated region body
PF: predicated region fallthrough
CT: control target
= control target key end

     0   :  { %s777_s12 = smov 0   ;;  %s779_s13 = smov 0   ;;  %s835_s0 = inlined_call_operand.vmem [shape: bf16[8,16,128], index: 0, kind: input, shape index: {}]   ;;  %s836_s1 = inlined_call_operand.vmem [shape: bf16[8,16,128], index: 1, kind: input, shape index: {}]   ;;  %s837_s2 = inlined_call_operand.vmem [shape: bf16[8,16,128], index: 2, kind: input, shape index: {}]   ;;  %s838_s3 = inlined_call_operand.vmem [shape: bf16[8,16,128], index: 3, kind: output, shape index: {}]  }
   0x1   :  { %s781_s14 = smov 0  }
   0x2 LB: > { %s32_s15 = sadd.s32 1, %s747_s13  ;;  %p640_p0 = scmp.ge.s32.totalorder %s751_s14, 1  ;;  %s751_s14 = sphi %s781_s14, %s13_s14   ;;  %s747_s13 = sphi %s779_s13, %s840_s13   ;;  %s743_s12 = sphi %s777_s12, %s839_s12  }
   0x3   : > { %p34_p1 = scmp.ge.s32.totalorder %s32_s15, 8  ;;  %p199_p2 = scmp.lt.s32.totalorder %s751_s14, 9 }
   0x5   : > { %s842_s15 = smov (%p34_p1, %s32_s15), 0  ;;  %p200_p3 = pnand %p640_p0, %p199_p2 }
   0x6   : > { %p250_p4 = scmp.lt.s32.totalorder (!%p200_p3), %s743_s12, 7  ;;  %v753_v0 = vmov (!%p200_p3), 0.0   ;;  %vm754_vm0 = vmmov (!%p200_p3), 0   ;;  %vm294_vm1 = vcmask (!%p200_p3), 7168   ;;  %v755_v3 = vmov (!%p200_p3), -inf  }
   0x7   : > { %203 = sbr.rel (%p200_p3) target bundleno = 826 (0x33a), region = 32  ;;  %672 = vmatprep.subr.bf16.mxu0 (!%p200_p3), %v753_v0  ;;  %674 = vmatprep.mubr.msk.bf16.mxu0 (!%p200_p3), %vm754_vm0, %v753_v0  ;;  %295 = vst.msk [vmem:[#allocation2] sm:$0xff] (!%p200_p3), %vm294_vm1, %v755_v3  ;;  %296 = vst.msk [vmem:[#allocation2 + $0x8] sm:$0xff] (!%p200_p3), %vm294_vm1, %v755_v3  ;;  %vm360_vm2 = vcmask (!%p200_p3), 130048   ;;  %v756_v10 = vmov (!%p200_p3), 0  }
   0x8   : > { %678 = vmatprep.subr.bf16.mxu1 (!%p200_p3), %v753_v0  ;;  %680 = vmatprep.mubr.msk.bf16.mxu1 (!%p200_p3), %vm754_vm0, %v753_v0  ;;  %297 = vst.msk [vmem:[#allocation3] sm:$0xff] (!%p200_p3), %vm294_vm1, %v753_v0  ;;  %298 = vst.msk [vmem:[#allocation3 + $0x8] sm:$0xff] (!%p200_p3), %vm294_vm1, %v753_v0 }
   0x9   : > { %712 = vset.pattern.permute.xlu1 (!%p200_p3), %v756_v10  ;;  %713 = vset.pattern.permute.xlu0 (!%p200_p3), %v756_v10 }
   0xe   : > { %s844_s12 = smov (!%p250_p4, %s743_s12), 7  ;;  %v358_v11 = vld [vmem:[#allocation2] sm:$0xff]  ;;  %v359_v14 = vld [vmem:[#allocation2 + $0x8] sm:$0xff] }
   0xf   : > { %s795_s16 = sshll.u32 %s844_s12, 3  ;;  %v391_v35 = vld [vmem:[#allocation3] sm:$0xff]  ;;  %v392_v38 = vld [vmem:[#allocation3 + $0x8] sm:$0xff] }
  0x10   : > { %s267_s19 = scalar_lea.vmem %s836_s1, %s795_s16  ;;  %s257_s22 = scalar_lea.vmem %s835_s0, %s795_s16 }
  0x11   : > { %v714_v1 = vld [vmem:[%s267_s19] sm:$0xff]   ;;  %s277_s25 = scalar_lea.vmem %s837_s2, %s795_s16  ;;  %s287_s28 = scalar_lea.vmem %s838_s3, %s795_s16 }
  0x12   : > { %673 = vmatpush3.bf16.xpose.msra.mxu0 %v714_v1  ;;  %v715_v2 = vld [vmem:[%s257_s22] sm:$0xff]  }
  0x13   : > { %v716_v19 = vld [vmem:[%s277_s25] sm:$0xff]  }
  0x14   : > { %679 = vmatpush3.bf16.msra.mxu1 %v716_v19 }
  0x19   : > { %675 = vmatmul.mubr.bf16.vlgmr.msra.gmra.mrb[0].mxu0 %v715_v2 }
  0xec   : > { %v351_v4 = vpop.f32.mrb[0].mxu0 }
  0xed   : > { %v676_v5 = vpop.f32.mrb[1].mxu0  ;;  %v361_v6 = vsel %vm360_vm2, %v351_v4, -inf }
  0xee   : > { %362 = vmax.xlane.f32.xlu0 %v361_v6  ;;  %v354_v7 = vpop.f32.mrb[2].mxu0 }
  0xef   : > { %v677_v8 = vpop.f32.mrb[3].mxu0  ;;  %v364_v9 = vsel %vm360_vm2, %v354_v7, -inf }
  0xf2   : > { %365 = vmax.xlane.f32.xlu0 %v364_v9 }
 0x17b   : > { %v363_v12 = vpop.xlane.xlu0 %362 }
 0x17c   : > { %v367_v13 = vmax.f32 %v358_v11, %v363_v12 }
 0x17e   : > { %v369_v15 = vsub.f32 %v358_v11, %v367_v13  ;;  %477 = vst.msk [vmem:[#allocation2] sm:$0xff] %vm294_vm1, %v367_v13  ;;  %377 = vperm.xlu1 %712, %v367_v13  }
 0x17f   : > { %v366_v16 = vpop.xlane.xlu0 %365 }
 0x180   : > { %v368_v17 = vmax.f32 %v359_v14, %v366_v16  ;;  %v371_v32 = vmul.f32 1.442695, %v369_v15 }
 0x182   : > { %v370_v18 = vsub.f32 %v359_v14, %v368_v17  ;;  %478 = vst.msk [vmem:[#allocation2 + $0x8] sm:$0xff] %vm294_vm1, %v368_v17  ;;  %382 = vperm.xlu1 %712, %v368_v17  }
 0x184   : > { %v373_v31 = vmul.f32 1.442695, %v370_v18 }
 0x1fd   : > { %v378_v20 = vpop.permute.xlu1 %377 }
 0x1fe   : > { %v385_v21 = vsub.f32 %v351_v4, %v378_v20 }
 0x200   : > { %v387_v22 = vmul.f32 1.442695, %v385_v21 }
 0x201   : > { %v383_v23 = vpop.permute.xlu1 %382 }
 0x202   : > { %717 = vpow2.f32 %v387_v22  ;;  %v386_v24 = vsub.f32 %v354_v7, %v383_v23 }
 0x204   : > { %v389_v25 = vmul.f32 1.442695, %v386_v24 }
 0x206   : > { %719 = vpow2.f32 %v389_v25 }
 0x207   : > { %721 = vpow2.f32 %v373_v31 }
 0x208   : > { %723 = vpow2.f32 %v371_v32 }
 0x20c   : > { %v718_v26 = vpop.eup %717 }
 0x20d   : > { %v395_v27 = vsel %vm360_vm2, %v718_v26, 0.0 }
 0x20e   : > { %396 = vadd.xlane.f32.xlu0 %v395_v27 }
 0x210   : > { %v720_v28 = vpop.eup %719 }
 0x211   : > { %v398_v29 = vsel %vm360_vm2, %v720_v28, 0.0  ;;  %v420_v30 = vpack.c.bf16 %v720_v28, %v718_v26  ;;  %v722_v33 = vpop.eup %721 }
 0x212   : > { %399 = vadd.xlane.f32.xlu1 %v398_v29  ;;  %v724_v34 = vpop.eup %723  ;;  %v394_v40 = vmul.f32 %v722_v33, %v392_v38 }
 0x213   : > { %681 = vmatmul.mubr.msk.bf16.vlgmr.msra.gmra.mrb[0].mxu1 %vm360_vm2, %v420_v30  ;;  %v393_v36 = vmul.f32 %v724_v34, %v391_v35 }
 0x223   : > { %415 = vperm.xlu1 %712, %v722_v33  }
 0x224   : > { %410 = vperm.xlu0 %713, %v724_v34  }
 0x29b   : > { %v397_v37 = vpop.xlane.xlu0 %396 }
 0x29c   : > { %v401_v39 = vadd.f32 %v397_v37, %v393_v36 }
 0x29e   : > { %404 = vst.msk [vmem:[#allocation3] sm:$0xff] %vm294_vm1, %v401_v39 }
 0x29f   : > { %v400_v41 = vpop.xlane.xlu1 %399 }
 0x2a0   : > { %v402_v42 = vadd.f32 %v400_v41, %v394_v40 }
 0x2a2   : > { %405 = vst.msk [vmem:[#allocation3 + $0x8] sm:$0xff] %vm294_vm1, %v402_v42 }
 0x2a3   : > { %v411_v51 = vpop.permute.xlu0 %410  ;;  %v416_v52 = vpop.permute.xlu1 %415 }
 0x2a4   : > { %v419_v54 = vmul.f32 0.0, %v416_v52  ;;  %v418_v55 = vmul.f32 0.0, %v411_v51 }
 0x2a5   : > { %v482_v43 = vld [vmem:[#allocation3] sm:$0xff] }
 0x2a6   : > { %725 = vrcp.f32 %v482_v43 }
 0x2a9   : > { %v483_v44 = vld [vmem:[#allocation3 + $0x8] sm:$0xff] }
 0x2aa   : > { %727 = vrcp.f32 %v483_v44 }
 0x2b0   : > { %v726_v45 = vpop.eup %725 }
 0x2b1   : > { %490 = vperm.xlu0 %713, %v726_v45  }
 0x2b4   : > { %v728_v46 = vpop.eup %727 }
 0x2b5   : > { %495 = vperm.xlu0 %713, %v728_v46  }
 0x2e6   : > { %v466_v47 = vpop.f32.mrb[0].mxu1 }
 0x2e7   : > { %v682_v48 = vpop.f32.mrb[1].mxu1  ;;  %v473_v56 = vadd.f32 %v466_v47, %v418_v55 }
 0x2e8   : > { %v469_v49 = vpop.f32.mrb[2].mxu1 }
 0x2e9   : > { %v683_v50 = vpop.f32.mrb[3].mxu1  ;;  %v474_v57 = vadd.f32 %v469_v49, %v419_v54 }
 0x330   : > { %v491_v53 = vpop.permute.xlu0 %490 }
 0x331   : > { %v498_v59 = vmul.f32 %v491_v53, %v473_v56 }
 0x334   : > { %v496_v58 = vpop.permute.xlu0 %495 }
 0x335   : > { %v499_v60 = vmul.f32 %v496_v58, %v474_v57 }
 0x337   : > { %v666_v61 = vpack.c.bf16 %v499_v60, %v498_v59 }
 0x339   : > { %667 = vst [vmem:[%s287_s28] sm:$0xff] %v666_v61  }
 0x33a PF: > { %s13_s14 = sadd.s32 1, %s751_s14   ;;  %s839_s12 = smov %s747_s13 }
 0x33b   : > { %p10_p5 = scmp.ge.s32.totalorder %s13_s14, 10   ;;  %s840_s13 = smov %s842_s15 }
 0x33d   :  { %12 = sbr.rel (!%p10_p5) target bundleno = 2 (0x2), region = 76 }

// kernel: _lambda_.50
= control target key start
LH: loop header
LB: loop body
LE: loop exit
PB: predicated region body
PF: predicated region fallthrough
CT: control target
= control target key end

     0   :  { %s936_s12 = smov 0   ;;  %s938_s13 = smov 0   ;;  %s1064_s0 = inlined_call_operand.vmem [shape: f32[32,128], index: 0, kind: input, shape index: {}]   ;;  %s1065_s1 = inlined_call_operand.vmem [shape: bf16[128,512], index: 1, kind: input, shape index: {}]   ;;  %s1066_s2 = inlined_call_operand.vmem [shape: f32[1,512], index: 2, kind: input, shape index: {}]   ;;  %s1067_s3 = inlined_call_operand.vmem [shape: bf16[32,512], index: 3, kind: output, shape index: {}]  }
   0x1   :  { %s940_s14 = smov 0   ;;  %s942_s15 = smov 0  }
   0x2   :  { %s944_s16 = smov 0  }
   0x3 LB: > { %s28_s17 = sadd.s32 1, %s909_s15  ;;  %s751_s18 = sadd.s32 4294967295, %s913_s16   ;;  %s913_s16 = sphi %s944_s16, %s13_s16   ;;  %s909_s15 = sphi %s942_s15, %s1072_s15   ;;  %s905_s14 = sphi %s940_s14, %s1071_s14   ;;  %s901_s13 = sphi %s938_s13, %s1070_s13   ;;  %s897_s12 = sphi %s936_s12, %s1069_s12  }
   0x4   : > { %p30_p0 = scmp.ge.s32.totalorder %s28_s17, 2  ;;  %p76_p1 = scmp.ne.s32.totalorder %s901_s13, %s897_s12 }
   0x5   : > { %p77_p2 = scmp.eq.s32.totalorder %s913_s16, 0  ;;  %p134_p4 = scmp.eq.s32.totalorder %s751_s18, 1 }
   0x6   : > { %s1074_s17 = smov (%p30_p0, %s28_s17), 0  ;;  %s69_s20 = sadd.s32 1, %s901_s13 }
   0x7   : > { %p78_p3 = por %p77_p2, %p76_p1  ;;  %s65_s19 = ssub.s32 %s909_s15, %s1074_s17 }
   0x8   : > { %p67_p5 = scmp.eq.s32.totalorder %s65_s19, 0  ;;  %p971_p6 = por %p134_p4, %p76_p1 }
   0x9   : > { %p755_p7 = scmp.ge.s32.totalorder %s913_s16, 2 }
   0xa   : > { %s976_s22 = scalar_select %p67_p5, %s901_s13, %s69_s20  }
   0xb   : > { %168 = sbr.rel (%p755_p7) target bundleno = 30 (0x1e), region = 20 }
  0x12   : > { %171 = sbr.rel (!%p78_p3) target bundleno = 30 (0x1e), region = 24  ;;  %s173_s23 = sand.u32 (%p78_p3), 1, %s901_s13  }
  0x13   : > { %s788_s24 = sshll.u32 (%p78_p3), %s909_s15, 3  ;;  %s756_s25 = sshll.u32 (%p78_p3), %s173_s23, 7 }
  0x14   : > { %s984_s28 = scalar_lea.vmem (%p78_p3), %s1065_s1, %s788_s24  ;;  %s175_s29 = scalar_lea.vmem (%p78_p3), [#allocation3], %s756_s25 }
  0x15   : > { %v239_v0 = vld [vmem:[%s984_s28] sm:$0xff] (%p78_p3)  ;;  %v241_v1 = vld [vmem:[%s984_s28 + $0x10] sm:$0xff] (%p78_p3) }
  0x16   : > { %v243_v2 = vld [vmem:[%s984_s28 + $0x20] sm:$0xff] (%p78_p3)  ;;  %240 = vst [vmem:[%s175_s29] sm:$0xff] (%p78_p3), %v239_v0  ;;  %242 = vst [vmem:[%s175_s29 + $0x8] sm:$0xff] (%p78_p3), %v241_v1  ;;  %v245_v3 = vld [vmem:[%s984_s28 + $0x30] sm:$0xff] (%p78_p3) }
  0x17   : > { %244 = vst [vmem:[%s175_s29 + $0x10] sm:$0xff] (%p78_p3), %v243_v2  ;;  %v247_v4 = vld [vmem:[%s984_s28 + $0x40] sm:$0xff] (%p78_p3)  ;;  %v249_v5 = vld [vmem:[%s984_s28 + $0x50] sm:$0xff] (%p78_p3)  ;;  %246 = vst [vmem:[%s175_s29 + $0x18] sm:$0xff] (%p78_p3), %v245_v3 }
  0x18   : > { %248 = vst [vmem:[%s175_s29 + $0x20] sm:$0xff] (%p78_p3), %v247_v4  ;;  %250 = vst [vmem:[%s175_s29 + $0x28] sm:$0xff] (%p78_p3), %v249_v5  ;;  %v251_v6 = vld [vmem:[%s984_s28 + $0x60] sm:$0xff] (%p78_p3)  ;;  %v253_v7 = vld [vmem:[%s984_s28 + $0x70] sm:$0xff] (%p78_p3) }
  0x19   : > { %v255_v8 = vld [vmem:[%s984_s28 + $0x80] sm:$0xff]  ;;  %252 = vst [vmem:[%s175_s29 + $0x30] sm:$0xff] %v251_v6  ;;  %254 = vst [vmem:[%s175_s29 + $0x38] sm:$0xff] %v253_v7  ;;  %v257_v9 = vld [vmem:[%s984_s28 + $0x90] sm:$0xff] }
  0x1a   : > { %256 = vst [vmem:[%s175_s29 + $0x40] sm:$0xff] %v255_v8  ;;  %v259_v10 = vld [vmem:[%s984_s28 + $0xa0] sm:$0xff]  ;;  %v261_v11 = vld [vmem:[%s984_s28 + $0xb0] sm:$0xff]  ;;  %258 = vst [vmem:[%s175_s29 + $0x48] sm:$0xff] %v257_v9 }
  0x1b   : > { %260 = vst [vmem:[%s175_s29 + $0x50] sm:$0xff] %v259_v10  ;;  %262 = vst [vmem:[%s175_s29 + $0x58] sm:$0xff] %v261_v11  ;;  %v263_v12 = vld [vmem:[%s984_s28 + $0xc0] sm:$0xff]  ;;  %v265_v13 = vld [vmem:[%s984_s28 + $0xd0] sm:$0xff] }
  0x1c   : > { %v267_v14 = vld [vmem:[%s984_s28 + $0xe0] sm:$0xff]  ;;  %264 = vst [vmem:[%s175_s29 + $0x60] sm:$0xff] %v263_v12  ;;  %266 = vst [vmem:[%s175_s29 + $0x68] sm:$0xff] %v265_v13  ;;  %v269_v15 = vld [vmem:[%s984_s28 + $0xf0] sm:$0xff] }
  0x1d   : > { %268 = vst [vmem:[%s175_s29 + $0x70] sm:$0xff] %v267_v14  ;;  %270 = vst [vmem:[%s175_s29 + $0x78] sm:$0xff] %v269_v15 }
  0x1e PF: > { %p759_p8 = scmp.ge.s32.totalorder %s913_s16, 1  ;;  %p283_p9 = scmp.lt.s32.totalorder %s913_s16, 3 }
  0x20   : > { %p284_p10 = pnand %p759_p8, %p283_p9 }
  0x21   : > { %s290_s30 = sand.u32 (!%p284_p10), 1, %s897_s12   ;;  %v915_v16 = vmov (!%p284_p10), 0   ;;  %v363_v32 = vld [vmem:[%s1064_s0] sm:$0xff] (!%p284_p10)  ;;  %v364_v33 = vld [vmem:[%s1064_s0 + $0x8] sm:$0xff] (!%p284_p10)  ;;  %v365_v35 = vld [vmem:[%s1064_s0 + $0x10] sm:$0xff] (!%p284_p10)  ;;  %s762_s20 = sshll.u32 (!%p284_p10), %s905_s14, 1  ;;  %v547_v39 = vlaneseq (!%p284_p10) }
  0x22   : > { %287 = sbr.rel (%p284_p10) target bundleno = 297 (0x129), region = 66  ;;  %s760_s4 = sshll.u32 (!%p284_p10), %s290_s30, 7  ;;  %497 = vmatprep.mubr.bf16.mxu0 (!%p284_p10), %v915_v16  ;;  %507 = vmatprep.mubr.bf16.mxu1 (!%p284_p10), %v915_v16  ;;  %v366_v36 = vld [vmem:[%s1064_s0 + $0x18] sm:$0xff] (!%p284_p10)  ;;  %v367_v37 = vpack.c.bf16 (!%p284_p10), %v364_v33, %v363_v32 }
  0x23   : > { %s1007_s5 = scalar_lea.vmem (!%p284_p10), [#allocation3], %s760_s4  ;;  %v368_v38 = vpack.c.bf16 (!%p284_p10), %v366_v36, %v365_v35  ;;  %p336_p11 = scmp.lt.s32.totalorder (!%p284_p10), %s762_s20, 3  ;;  %v548_v40 = vshrl.u32 (!%p284_p10), %v547_v39, 7 }
  0x24   : > { %v851_v17 = vld [vmem:[%s1007_s5 + $0x4] ss:$8 sps:$4 sm:$0xff] (!%p284_p10)   ;;  %v853_v18 = vld [vmem:[%s1007_s5] ss:$8 sps:$4 sm:$0xff] (!%p284_p10)   ;;  %v854_v19 = vld [vmem:[%s1007_s5 + $0x14] ss:$8 sps:$4 sm:$0xff] (!%p284_p10)  }
  0x25   : > { %465 = vmatprep.subr.bf16.mxu0 (!%p284_p10), %v851_v17  ;;  %794 = vmatprep.subr.bf16.mxu1 (!%p284_p10), %v851_v17  ;;  %v856_v20 = vld [vmem:[%s1007_s5 + $0x10] ss:$8 sps:$4 sm:$0xff] (!%p284_p10)   ;;  %v857_v21 = vld [vmem:[%s1007_s5 + $0x24] ss:$8 sps:$4 sm:$0xff] (!%p284_p10)   ;;  %v859_v22 = vld [vmem:[%s1007_s5 + $0x20] ss:$8 sps:$4 sm:$0xff] (!%p284_p10)  }
  0x26   : > { %466 = vmatpush1.bf16.msra.mxu0 (!%p284_p10), %v853_v18  ;;  %802 = vmatpush1.bf16.msra.mxu1 (!%p284_p10), %v853_v18  ;;  %v860_v23 = vld [vmem:[%s1007_s5 + $0x34] ss:$8 sps:$4 sm:$0xff] (!%p284_p10)   ;;  %v862_v24 = vld [vmem:[%s1007_s5 + $0x30] ss:$8 sps:$4 sm:$0xff] (!%p284_p10)   ;;  %v863_v25 = vld [vmem:[%s1007_s5 + $0x44] ss:$8 sps:$4 sm:$0xff] (!%p284_p10)  }
  0x27   : > { %467 = vmatprep.subr.bf16.mxu0 (!%p284_p10), %v854_v19  ;;  %795 = vmatprep.subr.bf16.mxu1 (!%p284_p10), %v854_v19  ;;  %v865_v26 = vld [vmem:[%s1007_s5 + $0x40] ss:$8 sps:$4 sm:$0xff] (!%p284_p10)   ;;  %v866_v27 = vld [vmem:[%s1007_s5 + $0x54] ss:$8 sps:$4 sm:$0xff] (!%p284_p10)   ;;  %v868_v28 = vld [vmem:[%s1007_s5 + $0x50] ss:$8 sps:$4 sm:$0xff] (!%p284_p10)  }
  0x28   : > { %v869_v29 = vld [vmem:[%s1007_s5 + $0x64] ss:$8 sps:$4 sm:$0xff] (!%p284_p10)   ;;  %v871_v30 = vld [vmem:[%s1007_s5 + $0x60] ss:$8 sps:$4 sm:$0xff] (!%p284_p10)   ;;  %v872_v31 = vld [vmem:[%s1007_s5 + $0x74] ss:$8 sps:$4 sm:$0xff] (!%p284_p10)  }
  0x29   : > { %v874_v34 = vld [vmem:[%s1007_s5 + $0x70] ss:$8 sps:$4 sm:$0xff]   ;;  %s1076_s20 = smov (!%p336_p11, %s762_s20), 3  ;;  %v549_v41 = vsub.s32 0, %v548_v40  ;;  %v553_v43 = vsub.s32 1, %v548_v40  ;;  %s761_s26 = sshll.u32 %s290_s30, 5 }
  0x2a   : > { %468 = vmatpush1.bf16.msra.mxu0 %v856_v20  ;;  %803 = vmatpush1.bf16.msra.mxu1 %v856_v20  ;;  %s338_s25 = scalar_lea.vmem %s1066_s2, %s1076_s20  ;;  %s323_s27 = scalar_lea.vmem [#allocation4], %s761_s26 }
  0x2b   : > { %469 = vmatprep.subr.bf16.mxu0 %v857_v21  ;;  %796 = vmatprep.subr.bf16.mxu1 %v857_v21  ;;  %v545_v42 = vld [vmem:[%s338_s25] sm:$0x3]  ;;  %s793_s12 = sshll.u32 (%p971_p6), %s905_s14, 3 }
  0x2c   : > { %v550_v44 = vrot.slane %v545_v42, %v549_v41  ;;  %v554_v45 = vrot.slane %v545_v42, %v553_v43  ;;  %s605_s30 = scalar_lea.vmem (%p971_p6), %s1067_s3, %s793_s12 }
  0x2e   : > { %470 = vmatpush1.bf16.msra.mxu0 %v859_v22  ;;  %804 = vmatpush1.bf16.msra.mxu1 %v859_v22 }
  0x2f   : > { %471 = vmatprep.subr.bf16.mxu0 %v860_v23  ;;  %797 = vmatprep.subr.bf16.mxu1 %v860_v23 }
  0x32   : > { %472 = vmatpush1.bf16.msra.mxu0 %v862_v24  ;;  %805 = vmatpush1.bf16.msra.mxu1 %v862_v24 }
  0x33   : > { %473 = vmatprep.subr.bf16.mxu0 %v863_v25  ;;  %798 = vmatprep.subr.bf16.mxu1 %v863_v25 }
  0x36   : > { %474 = vmatpush1.bf16.msra.mxu0 %v865_v26  ;;  %806 = vmatpush1.bf16.msra.mxu1 %v865_v26 }
  0x37   : > { %475 = vmatprep.subr.bf16.mxu0 %v866_v27  ;;  %799 = vmatprep.subr.bf16.mxu1 %v866_v27 }
  0x3a   : > { %476 = vmatpush1.bf16.msra.mxu0 %v868_v28  ;;  %807 = vmatpush1.bf16.msra.mxu1 %v868_v28 }
  0x3b   : > { %477 = vmatprep.subr.bf16.mxu0 %v869_v29  ;;  %800 = vmatprep.subr.bf16.mxu1 %v869_v29 }
  0x3e   : > { %478 = vmatpush1.bf16.msra.mxu0 %v871_v30  ;;  %808 = vmatpush1.bf16.msra.mxu1 %v871_v30 }
  0x3f   : > { %479 = vmatprep.subr.bf16.mxu0 %v872_v31  ;;  %801 = vmatprep.subr.bf16.mxu1 %v872_v31 }
  0x42   : > { %480 = vmatpush1.bf16.msra.mxu0 %v874_v34  ;;  %809 = vmatpush1.bf16.msra.mxu1 %v874_v34 }
  0x45   : > { %498 = vmatmul.mubr.bf16.vlgmr.msra.gmra.mrb[0].mxu0 %v367_v37  ;;  %508 = vmatmul.mubr.bf16.vlgmr.msra.gmra.mrb[0].mxu1 %v368_v38 }
 0x118   : > { %v499_v46 = vpop.f32.mrb[0].mxu0  ;;  %v509_v47 = vpop.f32.mrb[0].mxu1 }
 0x119   : > { %v557_v48 = vadd.f32 %v550_v44, %v499_v46  ;;  %v561_v49 = vadd.f32 %v550_v44, %v509_v47  ;;  %v501_v50 = vpop.f32.mrb[1].mxu0  ;;  %v511_v51 = vpop.f32.mrb[1].mxu1 }
 0x11a   : > { %v558_v52 = vadd.f32 %v554_v45, %v501_v50  ;;  %v562_v53 = vadd.f32 %v554_v45, %v511_v51  ;;  %v503_v54 = vpop.f32.mrb[2].mxu0  ;;  %v513_v55 = vpop.f32.mrb[2].mxu1  ;;  %599 = sbr.rel (!%p971_p6) target bundleno = 297 (0x129), region = 82 }
 0x11b   : > { %v559_v56 = vadd.f32 %v550_v44, %v503_v54  ;;  %v563_v57 = vadd.f32 %v550_v44, %v513_v55  ;;  %v505_v58 = vpop.f32.mrb[3].mxu0  ;;  %v515_v59 = vpop.f32.mrb[3].mxu1 }
 0x11c   : > { %v789_v60 = vpack.c.bf16 %v558_v52, %v557_v48  ;;  %v791_v61 = vpack.c.bf16 %v562_v53, %v561_v49  ;;  %v560_v62 = vadd.f32 %v554_v45, %v505_v58  ;;  %v564_v63 = vadd.f32 %v554_v45, %v515_v59 }
 0x11e   : > { %589 = vst [vmem:[%s323_s27] sm:$0xff] %v789_v60  ;;  %591 = vst [vmem:[%s323_s27 + $0x10] sm:$0xff] %v791_v61  ;;  %v790_v0 = vpack.c.bf16 %v560_v62, %v559_v56  ;;  %v792_v1 = vpack.c.bf16 %v564_v63, %v563_v57 }
 0x120   : > { %590 = vst [vmem:[%s323_s27 + $0x8] sm:$0xff] %v790_v0  ;;  %592 = vst [vmem:[%s323_s27 + $0x18] sm:$0xff] %v792_v1 }
 0x125   : > { %v639_v2 = vld [vmem:[%s323_s27] sm:$0xff]  ;;  %v643_v4 = vld [vmem:[%s323_s27 + $0x10] sm:$0xff] }
 0x126   : > { %640 = vst [vmem:[%s605_s30] sm:$0xff] %v639_v2  ;;  %644 = vst [vmem:[%s605_s30 + $0x20] sm:$0xff] %v643_v4 }
 0x127   : > { %v641_v3 = vld [vmem:[%s323_s27 + $0x8] sm:$0xff]  ;;  %v645_v5 = vld [vmem:[%s323_s27 + $0x18] sm:$0xff] }
 0x128   : > { %642 = vst [vmem:[%s605_s30 + $0x10] sm:$0xff] %v641_v3  ;;  %646 = vst [vmem:[%s605_s30 + $0x30] sm:$0xff] %v645_v5 }
 0x129 PF: > { %s13_s16 = sadd.s32 1, %s913_s16   ;;  %s1069_s12 = smov %s901_s13 }
 0x12a   : > { %p10_p12 = scmp.ge.s32.totalorder %s13_s16, 4   ;;  %s1070_s13 = smov %s976_s22 }
 0x12b   : > { %s1071_s14 = smov %s909_s15  ;;  %s1072_s15 = smov %s1074_s17 }
 0x12c   :  { %12 = sbr.rel (!%p10_p12) target bundleno = 3 (0x3), region = 157 }

// kernel: _lambda_.49
= control target key start
LH: loop header
LB: loop body
LE: loop exit
PB: predicated region body
PF: predicated region fallthrough
CT: control target
= control target key end

     0   :  { %s153_s0 = inlined_call_operand.vmem [shape: f32[32,128], index: 0, kind: input, shape index: {}]   ;;  %s154_s1 = inlined_call_operand.vmem [shape: f32[1,128], index: 1, kind: input, shape index: {}]   ;;  %s155_s2 = inlined_call_operand.vmem [shape: f32[1,128], index: 2, kind: input, shape index: {}]   ;;  %s156_s3 = inlined_call_operand.vmem [shape: f32[32,128], index: 3, kind: output, shape index: {}]  }
   0x1   :  { %v14_v0 = vld [vmem:[%s153_s0] sm:$0xff]  ;;  %v16_v1 = vld [vmem:[%s153_s0 + $0x10] sm:$0xff]  ;;  %v15_v2 = vld [vmem:[%s153_s0 + $0x8] sm:$0xff] }
   0x2   :  { %18 = vadd.xlane.f32.xlu0 %v14_v0  ;;  %22 = vadd.xlane.f32.xlu1 %v16_v1  ;;  %v17_v3 = vld [vmem:[%s153_s0 + $0x18] sm:$0xff]  ;;  %v93_v33 = vld [vmem:[%s154_s1] ss:$0 sm:$0xff] }
   0x3   :  { %v94_v35 = vld [vmem:[%s155_s2] ss:$0 sm:$0xff] }
   0x6   :  { %20 = vadd.xlane.f32.xlu0 %v15_v2  ;;  %24 = vadd.xlane.f32.xlu1 %v17_v3 }
  0x8f   :  { %v19_v4 = vpop.xlane.xlu0 %18  ;;  %v23_v5 = vpop.xlane.xlu1 %22 }
  0x90   :  { %v27_v6 = vmul.f32 0.0078125, %v19_v4  ;;  %v29_v7 = vmul.f32 0.0078125, %v23_v5 }
  0x92   :  { %v31_v8 = vsub.f32 %v14_v0, %v27_v6  ;;  %v33_v9 = vsub.f32 %v16_v1, %v29_v7 }
  0x93   :  { %v21_v10 = vpop.xlane.xlu0 %20  ;;  %v25_v11 = vpop.xlane.xlu1 %24 }
  0x94   :  { %v28_v12 = vmul.f32 0.0078125, %v21_v10  ;;  %v35_v13 = vmul.f32 %v31_v8, %v31_v8  ;;  %v30_v14 = vmul.f32 0.0078125, %v25_v11  ;;  %v37_v17 = vmul.f32 %v33_v9, %v33_v9 }
  0x96   :  { %v32_v15 = vsub.f32 %v15_v2, %v28_v12  ;;  %39 = vadd.xlane.f32.xlu0 %v35_v13  ;;  %v34_v16 = vsub.f32 %v17_v3, %v30_v14 }
  0x98   :  { %v36_v18 = vmul.f32 %v32_v15, %v32_v15  ;;  %v38_v19 = vmul.f32 %v34_v16, %v34_v16 }
  0x9a   :  { %43 = vadd.xlane.f32.xlu0 %v37_v17  ;;  %41 = vadd.xlane.f32.xlu1 %v36_v18 }
  0x9e   :  { %45 = vadd.xlane.f32.xlu1 %v38_v19 }
 0x123   :  { %v40_v20 = vpop.xlane.xlu0 %39 }
 0x124   :  { %v47_v21 = vmul.f32 0.0078125, %v40_v20 }
 0x126   :  { %v51_v22 = vadd.f32 1e-05, %v47_v21 }
 0x127   :  { %v42_v23 = vpop.xlane.xlu1 %41  ;;  %v44_v24 = vpop.xlane.xlu0 %43 }
 0x128   :  { %95 = vrsqrt.f32 %v51_v22  ;;  %v48_v25 = vmul.f32 0.0078125, %v42_v23  ;;  %v49_v26 = vmul.f32 0.0078125, %v44_v24 }
 0x12a   :  { %v52_v27 = vadd.f32 1e-05, %v48_v25  ;;  %v53_v28 = vadd.f32 1e-05, %v49_v26 }
 0x12b   :  { %v46_v29 = vpop.xlane.xlu1 %45 }
 0x12c   :  { %97 = vrsqrt.f32 %v52_v27  ;;  %v50_v30 = vmul.f32 0.0078125, %v46_v29 }
 0x12d   :  { %99 = vrsqrt.f32 %v53_v28 }
 0x12e   :  { %v54_v31 = vadd.f32 1e-05, %v50_v30 }
 0x130   :  { %101 = vrsqrt.f32 %v54_v31 }
 0x132   :  { %v96_v32 = vpop.eup %95 }
 0x133   :  { %v59_v34 = vmul.f32 %v96_v32, %v31_v8 }
 0x135   :  { %v70_v36 = vmul.f32 %v93_v33, %v59_v34 }
 0x136   :  { %v98_v37 = vpop.eup %97 }
 0x137   :  { %v100_v38 = vpop.eup %99  ;;  %v81_v39 = vadd.f32 %v94_v35, %v70_v36  ;;  %v60_v40 = vmul.f32 %v98_v37, %v32_v15 }
 0x138   :  { %v61_v41 = vmul.f32 %v100_v38, %v33_v9 }
 0x139   :  { %85 = vst [vmem:[%s156_s3] sm:$0xff] %v81_v39  ;;  %v71_v42 = vmul.f32 %v93_v33, %v60_v40 }
 0x13a   :  { %v102_v43 = vpop.eup %101  ;;  %v72_v44 = vmul.f32 %v93_v33, %v61_v41 }
 0x13b   :  { %v82_v45 = vadd.f32 %v94_v35, %v71_v42  ;;  %v62_v46 = vmul.f32 %v102_v43, %v34_v16 }
 0x13c   :  { %v83_v47 = vadd.f32 %v94_v35, %v72_v44 }
 0x13d   :  { %86 = vst [vmem:[%s156_s3 + $0x8] sm:$0xff] %v82_v45  ;;  %v73_v48 = vmul.f32 %v93_v33, %v62_v46 }
 0x13e   :  { %87 = vst [vmem:[%s156_s3 + $0x10] sm:$0xff] %v83_v47 }
 0x13f   :  { %v84_v49 = vadd.f32 %v94_v35, %v73_v48 }
 0x141   :  { %88 = vst [vmem:[%s156_s3 + $0x18] sm:$0xff] %v84_v49 }

// kernel: _lambda_.54
= control target key start
LH: loop header
LB: loop body
LE: loop exit
PB: predicated region body
PF: predicated region fallthrough
CT: control target
= control target key end

     0   :  { %s327_s1 = inlined_call_operand.vmem [shape: bf16[128,128], index: 1, kind: input, shape index: {}]   ;;  %s328_s0 = inlined_call_operand.vmem [shape: f32[32,128], index: 0, kind: input, shape index: {}]   ;;  %s329_s2 = inlined_call_operand.vmem [shape: f32[1,128], index: 2, kind: input, shape index: {}]   ;;  %s330_s3 = inlined_call_operand.vmem [shape: bf16[32,128], index: 3, kind: output, shape index: {}]  }
   0x1   :  { %v254_v0 = vld [vmem:[%s327_s1] sm:$0xff]   ;;  %v255_v1 = vld [vmem:[%s327_s1 + $0x8] sm:$0xff]   ;;  %v256_v2 = vld [vmem:[%s327_s1 + $0x10] sm:$0xff]  }
   0x2   :  { %234 = vmatprep.subr.bf16.mxu0 %v254_v0  ;;  %v257_v3 = vld [vmem:[%s327_s1 + $0x18] sm:$0xff]   ;;  %v27_v4 = vld [vmem:[%s328_s0] sm:$0xff]  ;;  %v28_v5 = vld [vmem:[%s328_s0 + $0x8] sm:$0xff] }
   0x3   :  { %235 = vmatpush3.bf16.msra.mxu0 %v254_v0  ;;  %v31_v6 = vpack.c.bf16 %v28_v5, %v27_v4  ;;  %v258_v7 = vld [vmem:[%s327_s1 + $0x20] sm:$0xff]   ;;  %v259_v8 = vld [vmem:[%s327_s1 + $0x28] sm:$0xff]   ;;  %v260_v9 = vld [vmem:[%s327_s1 + $0x30] sm:$0xff]  }
   0x4   :  { %236 = vmatprep.subr.bf16.mxu0 %v255_v1  ;;  %v261_v10 = vld [vmem:[%s327_s1 + $0x38] sm:$0xff]   ;;  %v29_v11 = vld [vmem:[%s328_s0 + $0x10] sm:$0xff]  ;;  %v204_v15 = vld [vmem:[%s329_s2] ss:$0 sm:$0xff] }
   0x5   :  { %250 = vmatprep.mubr.bf16.mxu0 %v31_v6  ;;  %v30_v12 = vld [vmem:[%s328_s0 + $0x18] sm:$0xff] }
   0x6   :  { %v32_v13 = vpack.c.bf16 %v30_v12, %v29_v11 }
   0x7   :  { %237 = vmatpush3.bf16.msra.mxu0 %v255_v1 }
   0x8   :  { %238 = vmatprep.subr.bf16.mxu0 %v256_v2 }
   0xb   :  { %239 = vmatpush3.bf16.msra.mxu0 %v256_v2 }
   0xc   :  { %240 = vmatprep.subr.bf16.mxu0 %v257_v3 }
   0xf   :  { %241 = vmatpush3.bf16.msra.mxu0 %v257_v3 }
  0x10   :  { %242 = vmatprep.subr.bf16.mxu0 %v258_v7 }
  0x13   :  { %243 = vmatpush3.bf16.msra.mxu0 %v258_v7 }
  0x14   :  { %244 = vmatprep.subr.bf16.mxu0 %v259_v8 }
  0x17   :  { %245 = vmatpush3.bf16.msra.mxu0 %v259_v8 }
  0x18   :  { %246 = vmatprep.subr.bf16.mxu0 %v260_v9 }
  0x1b   :  { %247 = vmatpush3.bf16.msra.mxu0 %v260_v9 }
  0x1c   :  { %248 = vmatprep.subr.bf16.mxu0 %v261_v10 }
  0x1f   :  { %249 = vmatpush3.bf16.msra.mxu0 %v261_v10 }
  0x22   :  { %251 = vmatmul.mubr.bf16.vlgmr.msra.gmra.mrb[0].mxu0 %v32_v13 }
  0xf5   :  { %v252_v14 = vpop.f32.mrb[0].mxu0 }
  0xf6   :  { %v131_v16 = vpop.f32.mrb[1].mxu0  ;;  %v170_v18 = vadd.f32 %v252_v14, %v204_v15 }
  0xf7   :  { %v253_v17 = vpop.f32.mrb[2].mxu0  ;;  %v168_v21 = vadd.f32 %v204_v15, %v131_v16 }
  0xf8   :  { %v171_v19 = vadd.f32 %v253_v17, %v204_v15  ;;  %v134_v20 = vpop.f32.mrb[3].mxu0 }
  0xf9   :  { %v169_v22 = vadd.f32 %v204_v15, %v134_v20 }
  0xfa   :  { %v221_v23 = vpack.c.bf16 %v171_v19, %v170_v18 }
  0xfb   :  { %v216_v24 = vpack.c.bf16 %v169_v22, %v168_v21 }
  0xfc   :  { %223 = vst [vmem:[%s330_s3 + $0x8] sm:$0xff] %v221_v23  }
  0xfd   :  { %217 = vst [vmem:[%s330_s3] sm:$0xff] %v216_v24  }

// kernel: _lambda_.55
= control target key start
LH: loop header
LB: loop body
LE: loop exit
PB: predicated region body
PF: predicated region fallthrough
CT: control target
= control target key end

     0   :  { %v334_v1 = vmov 0   ;;  %v219_v23 = vlaneseq  ;;  %s430_s1 = inlined_call_operand.vmem [shape: bf16[128,256], index: 1, kind: input, shape index: {}]   ;;  %s431_s0 = inlined_call_operand.vmem [shape: f32[32,128], index: 0, kind: input, shape index: {}]   ;;  %s432_s2 = inlined_call_operand.vmem [shape: f32[1,256], index: 2, kind: input, shape index: {}]   ;;  %s433_s3 = inlined_call_operand.vmem [shape: bf16[32,256], index: 3, kind: output, shape index: {}]  }
   0x1   :  { %v310_v0 = vld [vmem:[%s430_s1 + $0x4] ss:$8 sps:$4 sm:$0xff]   ;;  %169 = vmatprep.mubr.bf16.mxu0 %v334_v1  ;;  %179 = vmatprep.mubr.bf16.mxu1 %v334_v1  ;;  %v312_v2 = vld [vmem:[%s430_s1] ss:$8 sps:$4 sm:$0xff]   ;;  %v313_v3 = vld [vmem:[%s430_s1 + $0x14] ss:$8 sps:$4 sm:$0xff]  }
   0x2   :  { %137 = vmatprep.subr.bf16.mxu0 %v310_v0  ;;  %293 = vmatprep.subr.bf16.mxu1 %v310_v0  ;;  %v315_v4 = vld [vmem:[%s430_s1 + $0x10] ss:$8 sps:$4 sm:$0xff]   ;;  %v316_v5 = vld [vmem:[%s430_s1 + $0x24] ss:$8 sps:$4 sm:$0xff]   ;;  %v318_v6 = vld [vmem:[%s430_s1 + $0x20] ss:$8 sps:$4 sm:$0xff]  }
   0x3   :  { %138 = vmatpush1.bf16.msra.mxu0 %v312_v2  ;;  %301 = vmatpush1.bf16.msra.mxu1 %v312_v2  ;;  %v319_v7 = vld [vmem:[%s430_s1 + $0x34] ss:$8 sps:$4 sm:$0xff]   ;;  %v321_v8 = vld [vmem:[%s430_s1 + $0x30] ss:$8 sps:$4 sm:$0xff]   ;;  %v322_v9 = vld [vmem:[%s430_s1 + $0x44] ss:$8 sps:$4 sm:$0xff]  }
   0x4   :  { %139 = vmatprep.subr.bf16.mxu0 %v313_v3  ;;  %294 = vmatprep.subr.bf16.mxu1 %v313_v3  ;;  %v324_v10 = vld [vmem:[%s430_s1 + $0x40] ss:$8 sps:$4 sm:$0xff]   ;;  %v325_v11 = vld [vmem:[%s430_s1 + $0x54] ss:$8 sps:$4 sm:$0xff]   ;;  %v327_v12 = vld [vmem:[%s430_s1 + $0x50] ss:$8 sps:$4 sm:$0xff]  }
   0x5   :  { %v328_v13 = vld [vmem:[%s430_s1 + $0x64] ss:$8 sps:$4 sm:$0xff]   ;;  %v330_v14 = vld [vmem:[%s430_s1 + $0x60] ss:$8 sps:$4 sm:$0xff]   ;;  %v331_v15 = vld [vmem:[%s430_s1 + $0x74] ss:$8 sps:$4 sm:$0xff]  }
   0x6   :  { %v333_v16 = vld [vmem:[%s430_s1 + $0x70] ss:$8 sps:$4 sm:$0xff]   ;;  %v35_v17 = vld [vmem:[%s431_s0] sm:$0xff]  ;;  %v36_v18 = vld [vmem:[%s431_s0 + $0x8] sm:$0xff]  ;;  %v220_v24 = vshrl.u32 %v219_v23, 7 }
   0x7   :  { %140 = vmatpush1.bf16.msra.mxu0 %v315_v4  ;;  %302 = vmatpush1.bf16.msra.mxu1 %v315_v4  ;;  %v37_v19 = vld [vmem:[%s431_s0 + $0x10] sm:$0xff]  ;;  %v38_v20 = vld [vmem:[%s431_s0 + $0x18] sm:$0xff]  ;;  %v39_v21 = vpack.c.bf16 %v36_v18, %v35_v17  ;;  %v217_v26 = vld [vmem:[%s432_s2] sm:$0x3] }
   0x8   :  { %141 = vmatprep.subr.bf16.mxu0 %v316_v5  ;;  %295 = vmatprep.subr.bf16.mxu1 %v316_v5  ;;  %v40_v22 = vpack.c.bf16 %v38_v20, %v37_v19  ;;  %v221_v25 = vsub.s32 0, %v220_v24  ;;  %v225_v27 = vsub.s32 1, %v220_v24 }
   0xa   :  { %v222_v28 = vrot.slane %v217_v26, %v221_v25  ;;  %v226_v29 = vrot.slane %v217_v26, %v225_v27 }
   0xb   :  { %142 = vmatpush1.bf16.msra.mxu0 %v318_v6  ;;  %303 = vmatpush1.bf16.msra.mxu1 %v318_v6 }
   0xc   :  { %143 = vmatprep.subr.bf16.mxu0 %v319_v7  ;;  %296 = vmatprep.subr.bf16.mxu1 %v319_v7 }
   0xf   :  { %144 = vmatpush1.bf16.msra.mxu0 %v321_v8  ;;  %304 = vmatpush1.bf16.msra.mxu1 %v321_v8 }
  0x10   :  { %145 = vmatprep.subr.bf16.mxu0 %v322_v9  ;;  %297 = vmatprep.subr.bf16.mxu1 %v322_v9 }
  0x13   :  { %146 = vmatpush1.bf16.msra.mxu0 %v324_v10  ;;  %305 = vmatpush1.bf16.msra.mxu1 %v324_v10 }
  0x14   :  { %147 = vmatprep.subr.bf16.mxu0 %v325_v11  ;;  %298 = vmatprep.subr.bf16.mxu1 %v325_v11 }
  0x17   :  { %148 = vmatpush1.bf16.msra.mxu0 %v327_v12  ;;  %306 = vmatpush1.bf16.msra.mxu1 %v327_v12 }
  0x18   :  { %149 = vmatprep.subr.bf16.mxu0 %v328_v13  ;;  %299 = vmatprep.subr.bf16.mxu1 %v328_v13 }
  0x1b   :  { %150 = vmatpush1.bf16.msra.mxu0 %v330_v14  ;;  %307 = vmatpush1.bf16.msra.mxu1 %v330_v14 }
  0x1c   :  { %151 = vmatprep.subr.bf16.mxu0 %v331_v15  ;;  %300 = vmatprep.subr.bf16.mxu1 %v331_v15 }
  0x1f   :  { %152 = vmatpush1.bf16.msra.mxu0 %v333_v16  ;;  %308 = vmatpush1.bf16.msra.mxu1 %v333_v16 }
  0x22   :  { %170 = vmatmul.mubr.bf16.vlgmr.msra.gmra.mrb[0].mxu0 %v39_v21  ;;  %180 = vmatmul.mubr.bf16.vlgmr.msra.gmra.mrb[0].mxu1 %v40_v22 }
  0xf5   :  { %v171_v30 = vpop.f32.mrb[0].mxu0  ;;  %v181_v31 = vpop.f32.mrb[0].mxu1 }
  0xf6   :  { %v229_v32 = vadd.f32 %v222_v28, %v171_v30  ;;  %v233_v33 = vadd.f32 %v222_v28, %v181_v31  ;;  %v173_v34 = vpop.f32.mrb[1].mxu0  ;;  %v183_v35 = vpop.f32.mrb[1].mxu1 }
  0xf7   :  { %v230_v36 = vadd.f32 %v226_v29, %v173_v34  ;;  %v234_v37 = vadd.f32 %v226_v29, %v183_v35  ;;  %v175_v38 = vpop.f32.mrb[2].mxu0  ;;  %v185_v39 = vpop.f32.mrb[2].mxu1 }
  0xf8   :  { %v231_v40 = vadd.f32 %v222_v28, %v175_v38  ;;  %v235_v41 = vadd.f32 %v222_v28, %v185_v39  ;;  %v177_v42 = vpop.f32.mrb[3].mxu0  ;;  %v187_v43 = vpop.f32.mrb[3].mxu1 }
  0xf9   :  { %v289_v44 = vpack.c.bf16 %v230_v36, %v229_v32  ;;  %v291_v45 = vpack.c.bf16 %v234_v37, %v233_v33  ;;  %v232_v46 = vadd.f32 %v226_v29, %v177_v42  ;;  %v236_v47 = vadd.f32 %v226_v29, %v187_v43 }
  0xfb   :  { %261 = vst [vmem:[%s433_s3] sm:$0xff] %v289_v44  ;;  %263 = vst [vmem:[%s433_s3 + $0x10] sm:$0xff] %v291_v45  ;;  %v290_v48 = vpack.c.bf16 %v232_v46, %v231_v40  ;;  %v292_v49 = vpack.c.bf16 %v236_v47, %v235_v41 }
  0xfd   :  { %262 = vst [vmem:[%s433_s3 + $0x8] sm:$0xff] %v290_v48  ;;  %264 = vst [vmem:[%s433_s3 + $0x18] sm:$0xff] %v292_v49 }

// kernel: _lambda_.41
= control target key start
LH: loop header
LB: loop body
LE: loop exit
PB: predicated region body
PF: predicated region fallthrough
CT: control target
= control target key end

     0   :  { %v525_v1 = vmov 0   ;;  %v53_v39 = vlaneseq  ;;  %s682_s1 = inlined_call_operand.vmem [shape: bf16[128,256], index: 1, kind: input, shape index: {}]   ;;  %s683_s3 = inlined_call_operand.vmem [shape: bf16[256,128], index: 3, kind: input, shape index: {}]   ;;  %s684_s0 = inlined_call_operand.vmem [shape: f32[32,128], index: 0, kind: input, shape index: {}]   ;;  %s685_s2 = inlined_call_operand.vmem [shape: f32[1,256], index: 2, kind: input, shape index: {}]   ;;  %s686_s4 = inlined_call_operand.vmem [shape: f32[1,128], index: 4, kind: input, shape index: {}]   ;;  %s687_s5 = inlined_call_operand.vmem [shape: f32[32,128], index: 5, kind: output, shape index: {}]  }
   0x1   :  { %v485_v0 = vld [vmem:[%s682_s1 + $0x4] ss:$8 sps:$4 sm:$0xff]   ;;  %175 = vmatprep.mubr.bf16.mxu0 %v525_v1  ;;  %v487_v2 = vld [vmem:[%s682_s1] ss:$8 sps:$4 sm:$0xff]   ;;  %v488_v3 = vld [vmem:[%s682_s1 + $0x14] ss:$8 sps:$4 sm:$0xff]  }
   0x2   :  { %143 = vmatprep.subr.bf16.mxu0 %v485_v0  ;;  %v490_v4 = vld [vmem:[%s682_s1 + $0x10] ss:$8 sps:$4 sm:$0xff]   ;;  %v491_v5 = vld [vmem:[%s682_s1 + $0x24] ss:$8 sps:$4 sm:$0xff]   ;;  %v493_v6 = vld [vmem:[%s682_s1 + $0x20] ss:$8 sps:$4 sm:$0xff]  }
   0x3   :  { %144 = vmatpush1.bf16.msra.mxu0 %v487_v2  ;;  %v494_v7 = vld [vmem:[%s682_s1 + $0x34] ss:$8 sps:$4 sm:$0xff]   ;;  %v496_v8 = vld [vmem:[%s682_s1 + $0x30] ss:$8 sps:$4 sm:$0xff]   ;;  %v497_v9 = vld [vmem:[%s682_s1 + $0x44] ss:$8 sps:$4 sm:$0xff]  }
   0x4   :  { %145 = vmatprep.subr.bf16.mxu0 %v488_v3  ;;  %v509_v10 = vld [vmem:[%s683_s3 + $0x40] sm:$0xff]   ;;  %v500_v13 = vld [vmem:[%s682_s1 + $0x54] ss:$8 sps:$4 sm:$0xff]   ;;  %v511_v14 = vld [vmem:[%s683_s3 + $0x48] sm:$0xff]   ;;  %v54_v40 = vshrl.u32 %v53_v39, 7 }
   0x5   :  { %v499_v11 = vld [vmem:[%s682_s1 + $0x40] ss:$8 sps:$4 sm:$0xff]   ;;  %456 = vmatprep.subr.bf16.mxu1 %v509_v10  ;;  %v513_v16 = vld [vmem:[%s683_s3 + $0x50] sm:$0xff]   ;;  %v503_v18 = vld [vmem:[%s682_s1 + $0x64] ss:$8 sps:$4 sm:$0xff]  }
   0x6   :  { %v510_v12 = vld [vmem:[%s683_s3] sm:$0xff]   ;;  %v512_v15 = vld [vmem:[%s683_s3 + $0x8] sm:$0xff]   ;;  %v502_v17 = vld [vmem:[%s682_s1 + $0x50] ss:$8 sps:$4 sm:$0xff]   ;;  %v55_v41 = vsub.s32 0, %v54_v40  ;;  %v59_v43 = vsub.s32 1, %v54_v40 }
   0x7   :  { %146 = vmatpush1.bf16.msra.mxu0 %v490_v4  ;;  %457 = vmatpush3.bf16.msra.mxu1 %v510_v12  ;;  %v514_v19 = vld [vmem:[%s683_s3 + $0x10] sm:$0xff]   ;;  %v515_v20 = vld [vmem:[%s683_s3 + $0x58] sm:$0xff]   ;;  %v505_v21 = vld [vmem:[%s682_s1 + $0x60] ss:$8 sps:$4 sm:$0xff]  }
   0x8   :  { %147 = vmatprep.subr.bf16.mxu0 %v491_v5  ;;  %458 = vmatprep.subr.bf16.mxu1 %v511_v14  ;;  %v506_v22 = vld [vmem:[%s682_s1 + $0x74] ss:$8 sps:$4 sm:$0xff]   ;;  %v517_v24 = vld [vmem:[%s683_s3 + $0x60] sm:$0xff]   ;;  %v508_v25 = vld [vmem:[%s682_s1 + $0x70] ss:$8 sps:$4 sm:$0xff]  }
   0x9   :  { %v516_v23 = vld [vmem:[%s683_s3 + $0x18] sm:$0xff]   ;;  %v29_v26 = vld [vmem:[%s684_s0] sm:$0xff]  ;;  %v30_v27 = vld [vmem:[%s684_s0 + $0x8] sm:$0xff] }
   0xa   :  { %v518_v28 = vld [vmem:[%s683_s3 + $0x20] sm:$0xff]   ;;  %v519_v29 = vld [vmem:[%s683_s3 + $0x68] sm:$0xff]   ;;  %v33_v30 = vpack.c.bf16 %v30_v27, %v29_v26  ;;  %v31_v31 = vld [vmem:[%s684_s0 + $0x10] sm:$0xff] }
   0xb   :  { %148 = vmatpush1.bf16.msra.mxu0 %v493_v6  ;;  %459 = vmatpush3.bf16.msra.mxu1 %v512_v15  ;;  %v32_v32 = vld [vmem:[%s684_s0 + $0x18] sm:$0xff]  ;;  %v520_v34 = vld [vmem:[%s683_s3 + $0x28] sm:$0xff]   ;;  %v521_v35 = vld [vmem:[%s683_s3 + $0x70] sm:$0xff]  }
   0xc   :  { %149 = vmatprep.subr.bf16.mxu0 %v494_v7  ;;  %460 = vmatprep.subr.bf16.mxu1 %v513_v16  ;;  %v34_v33 = vpack.c.bf16 %v32_v32, %v31_v31  ;;  %v522_v36 = vld [vmem:[%s683_s3 + $0x30] sm:$0xff]   ;;  %v523_v37 = vld [vmem:[%s683_s3 + $0x78] sm:$0xff]   ;;  %v51_v42 = vld [vmem:[%s685_s2] sm:$0x3] }
   0xd   :  { %v524_v38 = vld [vmem:[%s683_s3 + $0x38] sm:$0xff]   ;;  %v56_v44 = vrot.slane %v51_v42, %v55_v41  ;;  %v60_v45 = vrot.slane %v51_v42, %v59_v43  ;;  %v455_v12 = vld [vmem:[%s686_s4] ss:$0 sm:$0xff] }
   0xf   :  { %150 = vmatpush1.bf16.msra.mxu0 %v496_v8  ;;  %461 = vmatpush3.bf16.msra.mxu1 %v514_v19 }
  0x10   :  { %151 = vmatprep.subr.bf16.mxu0 %v497_v9  ;;  %462 = vmatprep.subr.bf16.mxu1 %v515_v20 }
  0x13   :  { %152 = vmatpush1.bf16.msra.mxu0 %v499_v11  ;;  %463 = vmatpush3.bf16.msra.mxu1 %v516_v23 }
  0x14   :  { %153 = vmatprep.subr.bf16.mxu0 %v500_v13  ;;  %464 = vmatprep.subr.bf16.mxu1 %v517_v24 }
  0x17   :  { %154 = vmatpush1.bf16.msra.mxu0 %v502_v17  ;;  %465 = vmatpush3.bf16.msra.mxu1 %v518_v28 }
  0x18   :  { %155 = vmatprep.subr.bf16.mxu0 %v503_v18  ;;  %466 = vmatprep.subr.bf16.mxu1 %v519_v29 }
  0x1b   :  { %156 = vmatpush1.bf16.msra.mxu0 %v505_v21  ;;  %467 = vmatpush3.bf16.msra.mxu1 %v520_v34 }
  0x1c   :  { %157 = vmatprep.subr.bf16.mxu0 %v506_v22  ;;  %468 = vmatprep.subr.bf16.mxu1 %v521_v35 }
  0x1f   :  { %158 = vmatpush1.bf16.msra.mxu0 %v508_v25  ;;  %469 = vmatpush3.bf16.msra.mxu1 %v522_v36 }
  0x20   :  { %470 = vmatprep.subr.bf16.mxu1 %v523_v37 }
  0x22   :  { %176 = vmatmul.mubr.bf16.vlgmr.msra.gmra.mrb[0].mxu0 %v33_v30 }
  0x23   :  { %185 = vmatprep.mubr.bf16.mxu0 %v525_v1  ;;  %471 = vmatpush3.bf16.msra.mxu1 %v524_v38 }
  0x2a   :  { %186 = vmatmul.mubr.bf16.gmra.mrb[4].mxu0 %v34_v33 }
  0xf5   :  { %v177_v46 = vpop.f32.mrb[0].mxu0 }
  0xf6   :  { %v178_v47 = vadd.f32 %v177_v46, %v56_v44  ;;  %v179_v48 = vpop.f32.mrb[1].mxu0 }
  0xf7   :  { %v180_v49 = vadd.f32 %v179_v48, %v60_v45  ;;  %v181_v50 = vpop.f32.mrb[2].mxu0 }
  0xf8   :  { %v182_v51 = vadd.f32 %v181_v50, %v56_v44  ;;  %v183_v52 = vpop.f32.mrb[3].mxu0  ;;  %v196_v54 = vmax.f32 %v178_v47, 0.0 }
  0xf9   :  { %v184_v53 = vadd.f32 %v183_v52, %v60_v45  ;;  %v197_v56 = vmax.f32 %v180_v49, 0.0 }
  0xfa   :  { %v198_v55 = vmax.f32 %v182_v51, 0.0 }
  0xfb   :  { %v199_v57 = vmax.f32 %v184_v53, 0.0 }
  0xfc   :  { %v208_v58 = vpack.c.bf16 %v198_v55, %v196_v54 }
  0xfd   :  { %v187_v59 = vpop.f32.mrb[4].mxu0  ;;  %v209_v60 = vpack.c.bf16 %v199_v57, %v197_v56 }
  0xfe   :  { %v188_v61 = vadd.f32 %v187_v59, %v56_v44  ;;  %v189_v62 = vpop.f32.mrb[5].mxu0 }
  0xff   :  { %v190_v63 = vadd.f32 %v189_v62, %v60_v45  ;;  %v191_v0 = vpop.f32.mrb[6].mxu0  ;;  %372 = vmatprep.mubr.bf16.mxu1 %v209_v60 }
 0x100   :  { %v192_v1 = vadd.f32 %v191_v0, %v56_v44  ;;  %v193_v2 = vpop.f32.mrb[7].mxu0  ;;  %373 = vmatmul.mubr.bf16.vlgmr.msra.gmra.mrb[0].mxu1 %v208_v58  ;;  %v200_v4 = vmax.f32 %v188_v61, 0.0 }
 0x101   :  { %v194_v3 = vadd.f32 %v193_v2, %v60_v45  ;;  %v201_v6 = vmax.f32 %v190_v63, 0.0 }
 0x102   :  { %v202_v5 = vmax.f32 %v192_v1, 0.0 }
 0x103   :  { %v203_v7 = vmax.f32 %v194_v3, 0.0 }
 0x104   :  { %v210_v8 = vpack.c.bf16 %v202_v5, %v200_v4 }
 0x105   :  { %v211_v9 = vpack.c.bf16 %v203_v7, %v201_v6 }
 0x107   :  { %380 = vmatprep.mubr.bf16.mxu1 %v211_v9 }
 0x108   :  { %381 = vmatmul.mubr.bf16.gmra.mrb[4].mxu1 %v210_v8 }
 0x1d3   :  { %v472_v10 = vpop.f32.mrb[0].mxu1 }
 0x1d4   :  { %v473_v11 = vpop.f32.mrb[1].mxu1 }
 0x1d5   :  { %v474_v13 = vadd.f32 %v473_v11, %v472_v10  ;;  %v475_v14 = vpop.f32.mrb[2].mxu1 }
 0x1d6   :  { %v476_v15 = vpop.f32.mrb[3].mxu1 }
 0x1d7   :  { %v411_v16 = vadd.f32 %v474_v13, %v455_v12  ;;  %v477_v17 = vadd.f32 %v476_v15, %v475_v14 }
 0x1d9   :  { %415 = vst [vmem:[%s687_s5] sm:$0xff] %v411_v16  ;;  %v412_v18 = vadd.f32 %v477_v17, %v455_v12 }
 0x1db   :  { %416 = vst [vmem:[%s687_s5 + $0x8] sm:$0xff] %v412_v18  ;;  %v478_v19 = vpop.f32.mrb[4].mxu1 }
 0x1dc   :  { %v479_v20 = vpop.f32.mrb[5].mxu1 }
 0x1dd   :  { %v480_v21 = vadd.f32 %v479_v20, %v478_v19  ;;  %v481_v22 = vpop.f32.mrb[6].mxu1 }
 0x1de   :  { %v482_v23 = vpop.f32.mrb[7].mxu1 }
 0x1df   :  { %v413_v24 = vadd.f32 %v480_v21, %v455_v12  ;;  %v483_v25 = vadd.f32 %v482_v23, %v481_v22 }
 0x1e1   :  { %417 = vst [vmem:[%s687_s5 + $0x10] sm:$0xff] %v413_v24  ;;  %v414_v26 = vadd.f32 %v483_v25, %v455_v12 }
 0x1e3   :  { %418 = vst [vmem:[%s687_s5 + $0x18] sm:$0xff] %v414_v26 }

// kernel: _lambda_.73
= control target key start
LH: loop header
LB: loop body
LE: loop exit
PB: predicated region body
PF: predicated region fallthrough
CT: control target
= control target key end

     0   :  { %v346_v2 = vmov 0   ;;  %s445_s0 = inlined_call_operand.vmem [shape: f32[32,128], index: 0, kind: input, shape index: {}]   ;;  %s446_s1 = inlined_call_operand.vmem [shape: bf16[128,256], index: 1, kind: input, shape index: {}]   ;;  %s447_s2 = inlined_call_operand.vmem [shape: f32[1,256], index: 2, kind: input, shape index: {}]   ;;  %s448_s3 = inlined_call_operand.hbm [shape: f32[32,256], index: 3, kind: output, shape index: {}]  }
   0x1   :  { %v298_v0 = vld [vmem:[%s446_s1 + $0x4] ss:$8 sps:$4 sm:$0xff]   ;;  %v300_v1 = vld [vmem:[%s446_s1] ss:$8 sps:$4 sm:$0xff]   ;;  %170 = vmatprep.mubr.bf16.mxu0 %v346_v2  ;;  %180 = vmatprep.mubr.bf16.mxu1 %v346_v2  ;;  %v301_v3 = vld [vmem:[%s446_s1 + $0x14] ss:$8 sps:$4 sm:$0xff]  }
   0x2   :  { %138 = vmatprep.subr.bf16.mxu0 %v298_v0  ;;  %278 = vmatprep.subr.bf16.mxu1 %v298_v0  ;;  %v303_v4 = vld [vmem:[%s446_s1 + $0x10] ss:$8 sps:$4 sm:$0xff]   ;;  %v304_v5 = vld [vmem:[%s446_s1 + $0x24] ss:$8 sps:$4 sm:$0xff]   ;;  %v306_v6 = vld [vmem:[%s446_s1 + $0x20] ss:$8 sps:$4 sm:$0xff]  }
   0x3   :  { %139 = vmatpush1.bf16.msra.mxu0 %v300_v1  ;;  %286 = vmatpush1.bf16.msra.mxu1 %v300_v1  ;;  %v307_v7 = vld [vmem:[%s446_s1 + $0x34] ss:$8 sps:$4 sm:$0xff]   ;;  %v309_v8 = vld [vmem:[%s446_s1 + $0x30] ss:$8 sps:$4 sm:$0xff]   ;;  %v310_v9 = vld [vmem:[%s446_s1 + $0x44] ss:$8 sps:$4 sm:$0xff]  }
   0x4   :  { %140 = vmatprep.subr.bf16.mxu0 %v301_v3  ;;  %279 = vmatprep.subr.bf16.mxu1 %v301_v3 }
   0x7   :  { %141 = vmatpush1.bf16.msra.mxu0 %v303_v4  ;;  %287 = vmatpush1.bf16.msra.mxu1 %v303_v4 }
   0x8   :  { %142 = vmatprep.subr.bf16.mxu0 %v304_v5  ;;  %280 = vmatprep.subr.bf16.mxu1 %v304_v5 }
   0xb   :  { %143 = vmatpush1.bf16.msra.mxu0 %v306_v6  ;;  %288 = vmatpush1.bf16.msra.mxu1 %v306_v6 }
   0xc   :  { %144 = vmatprep.subr.bf16.mxu0 %v307_v7  ;;  %281 = vmatprep.subr.bf16.mxu1 %v307_v7 }
   0xd   :  { %8 = vsyncpa [#allocation4], 0  ;;  %v312_v10 = vld [vmem:[%s446_s1 + $0x40] ss:$8 sps:$4 sm:$0xff]   ;;  %v313_v11 = vld [vmem:[%s446_s1 + $0x54] ss:$8 sps:$4 sm:$0xff]   ;;  %v220_v23 = vlaneseq }
   0xe   :  { %v315_v12 = vld [vmem:[%s446_s1 + $0x50] ss:$8 sps:$4 sm:$0xff]   ;;  %v316_v13 = vld [vmem:[%s446_s1 + $0x64] ss:$8 sps:$4 sm:$0xff]   ;;  %v318_v14 = vld [vmem:[%s446_s1 + $0x60] ss:$8 sps:$4 sm:$0xff]  }
   0xf   :  { %145 = vmatpush1.bf16.msra.mxu0 %v309_v8  ;;  %289 = vmatpush1.bf16.msra.mxu1 %v309_v8  ;;  %v319_v15 = vld [vmem:[%s446_s1 + $0x74] ss:$8 sps:$4 sm:$0xff]   ;;  %v321_v16 = vld [vmem:[%s446_s1 + $0x70] ss:$8 sps:$4 sm:$0xff]   ;;  %v36_v17 = vld [vmem:[%s445_s0] sm:$0xff]  ;;  %v221_v24 = vshrl.u32 %v220_v23, 7 }
  0x10   :  { %146 = vmatprep.subr.bf16.mxu0 %v310_v9  ;;  %282 = vmatprep.subr.bf16.mxu1 %v310_v9  ;;  %v37_v18 = vld [vmem:[%s445_s0 + $0x8] sm:$0xff]  ;;  %v38_v19 = vld [vmem:[%s445_s0 + $0x10] sm:$0xff]  ;;  %v39_v20 = vld [vmem:[%s445_s0 + $0x18] sm:$0xff]  ;;  %s347_s0 = smov [#allocation3]  }
  0x11   :  { %v40_v21 = vpack.c.bf16 %v37_v18, %v36_v17  ;;  %v41_v22 = vpack.c.bf16 %v39_v20, %v38_v19  ;;  %v222_v25 = vsub.s32 0, %v221_v24  ;;  %v218_v26 = vld [vmem:[%s447_s2] sm:$0x3]  ;;  %v226_v27 = vsub.s32 1, %v221_v24  ;;  %s251_s26 = sshll.u32 %s347_s0, 4  ;;  %s252_s26 = int_to_ptr.vmem [resolvable:$true] %s251_s26 }
  0x12   :  { %s322_s2 = scalar_lea.vmem %s252_s26, 1024  ;;  %p327_p1 = scmp.lt.s32.totalorder %s252_s26, %s252_s26 }
  0x13   :  { %147 = vmatpush1.bf16.msra.mxu0 %v312_v10  ;;  %290 = vmatpush1.bf16.msra.mxu1 %v312_v10  ;;  %v223_v28 = vrot.slane %v218_v26, %v222_v25  ;;  %v227_v29 = vrot.slane %v218_v26, %v226_v27  ;;  %p323_p0 = scmp.ne.s32.totalorder %s252_s26, %s322_s2  ;;  %p328_p2 = scmp.lt.s32.totalorder %s322_s2, %s322_s2 }
  0x14   :  { %148 = vmatprep.subr.bf16.mxu0 %v313_v11  ;;  %283 = vmatprep.subr.bf16.mxu1 %v313_v11 }
  0x15   :  { %p329_p3 = por %p328_p2, %p327_p1 }
  0x17   :  { %149 = vmatpush1.bf16.msra.mxu0 %v315_v12  ;;  %291 = vmatpush1.bf16.msra.mxu1 %v315_v12  ;;  %p330_p4 = pnand %p329_p3, %p323_p0 }
  0x18   :  { %150 = vmatprep.subr.bf16.mxu0 %v316_v13  ;;  %284 = vmatprep.subr.bf16.mxu1 %v316_v13 }
  0x1b   :  { %151 = vmatpush1.bf16.msra.mxu0 %v318_v14  ;;  %292 = vmatpush1.bf16.msra.mxu1 %v318_v14 }
  0x1c   :  { %152 = vmatprep.subr.bf16.mxu0 %v319_v15  ;;  %285 = vmatprep.subr.bf16.mxu1 %v319_v15 }
  0x1f   :  { %153 = vmatpush1.bf16.msra.mxu0 %v321_v16  ;;  %293 = vmatpush1.bf16.msra.mxu1 %v321_v16 }
  0x22   :  { %171 = vmatmul.mubr.bf16.vlgmr.msra.gmra.mrb[0].mxu0 %v40_v21  ;;  %181 = vmatmul.mubr.bf16.vlgmr.msra.gmra.mrb[0].mxu1 %v41_v22 }
  0xf5   :  { %v172_v30 = vpop.f32.mrb[0].mxu0  ;;  %v182_v31 = vpop.f32.mrb[0].mxu1 }
  0xf6   :  { %v230_v32 = vadd.f32 %v223_v28, %v172_v30  ;;  %v234_v33 = vadd.f32 %v223_v28, %v182_v31  ;;  %v174_v34 = vpop.f32.mrb[1].mxu0  ;;  %v184_v35 = vpop.f32.mrb[1].mxu1 }
  0xf7   :  { %v231_v36 = vadd.f32 %v227_v29, %v174_v34  ;;  %v235_v37 = vadd.f32 %v227_v29, %v184_v35  ;;  %v176_v38 = vpop.f32.mrb[2].mxu0  ;;  %v186_v39 = vpop.f32.mrb[2].mxu1 }
  0xf8   :  { %238 = vst [vmem:[#allocation3] sm:$0xff] %v230_v32  ;;  %242 = vst [vmem:[#allocation3 + $0x20] sm:$0xff] %v234_v33  ;;  %v232_v40 = vadd.f32 %v223_v28, %v176_v38  ;;  %v236_v41 = vadd.f32 %v223_v28, %v186_v39  ;;  %v178_v42 = vpop.f32.mrb[3].mxu0  ;;  %v188_v43 = vpop.f32.mrb[3].mxu1 }
  0xf9   :  { %239 = vst [vmem:[#allocation3 + $0x8] sm:$0xff] %v231_v36  ;;  %243 = vst [vmem:[#allocation3 + $0x28] sm:$0xff] %v235_v37  ;;  %v233_v44 = vadd.f32 %v227_v29, %v178_v42  ;;  %v237_v45 = vadd.f32 %v227_v29, %v188_v43 }
  0xfa   :  { %240 = vst [vmem:[#allocation3 + $0x10] sm:$0xff] %v232_v40  ;;  %244 = vst [vmem:[#allocation3 + $0x30] sm:$0xff] %v236_v41 }
  0xfb   :  { %241 = vst [vmem:[#allocation3 + $0x18] sm:$0xff] %v233_v44  ;;  %245 = vst [vmem:[#allocation3 + $0x38] sm:$0xff] %v237_v45 }
  0xfc   :  { %333 = shalt.err (!%p330_p4)
}
  0xfd   :  { %s334_s29 = scalar_lea.hbm %s448_s3, 1024 }
  0xfe   :  { %p335_p5 = scmp.ne.s32.totalorder %s448_s3, %s334_s29  ;;  %p338_p6 = scmp.lt.u32.totalorder %s334_s29, %s448_s3 }
 0x100   :  { %p340_p7 = pnand %p338_p6, %p335_p5 }
 0x102   :  { %343 = shalt.err (!%p340_p7)
}
 0x103   :  { %s348_s7 = smov 256   ;;  %s349_s8 = smov 16  }
 0x104   :  { %257 = dma.vmem_to_hbm [thread:$0]  %s252_s26, 1024, %s448_s3, [#allocation4], %s348_s7, %s348_s7, %s349_s8  }
 0x105   :  { %344 = dma.done.wait [#allocation4], 1024  }
 0x106   :  { %345 = vsyncadd [#allocation4], 4294966272 }
 0x107   :  { %261 = vsyncpa [#allocation4], 1 }

</bundles_post_ra>
